<compile_context>
chip_gen: v6e
topology: v6e:2x2x1
jax: 0.10.0
libtpu: 0.0.40
codegen_flags: <defaults>
</compile_context>

<pallas_src>
import functools

import jax
import jax.numpy as jnp
from jax.experimental import pallas as pl
from jax.experimental.pallas import tpu as pltpu


# ----------------------------------------------------------------------------
# Pallas kernel 1: fused conv GEMM
#   out[Cout, tm] = relu?( W[Cout,K] @ A[K,tm] + shift[Cout,1] (+ residual) )
# ----------------------------------------------------------------------------
def _conv_gemm_kernel(w_ref, a_ref, shift_ref, *refs, relu_rows, has_residual):
    if has_residual:
        res_ref, o_ref = refs
    else:
        (o_ref,) = refs
    acc = jnp.dot(w_ref[...], a_ref[...], preferred_element_type=jnp.float32)
    out = acc + shift_ref[...]
    if has_residual:
        out = out + res_ref[...]
    n_rows = out.shape[0]
    if relu_rows >= n_rows:
        out = jnp.maximum(out, 0.0)
    elif relu_rows > 0:
        # partial ReLU (fused conv1 + projection shortcut share one GEMM)
        row = jax.lax.broadcasted_iota(jnp.int32, out.shape, 0)
        out = jnp.where(row < relu_rows, jnp.maximum(out, 0.0), out)
    o_ref[...] = out.astype(o_ref.dtype)


def conv_gemm(w, a, shift, residual=None, relu_rows=0):
    """w:[Cout,K] (BN scale folded)  a:[K,M]  shift:[Cout,1]  residual:[Cout,M]."""
    Cout, K = w.shape
    K2, M = a.shape
    assert K == K2
    # lane-dense tile over M (the long B*Ho*Wo axis)
    if M >= 2048:
        tm = 512
    elif M >= 512 and M % 256 == 0:
        tm = 256
    else:
        tm = M
    grid = (pl.cdiv(M, tm),)

    kernel = functools.partial(_conv_gemm_kernel, relu_rows=relu_rows,
                               has_residual=residual is not None)
    in_specs = [
        pl.BlockSpec((Cout, K), lambda i: (0, 0)),   # weight: stays resident
        pl.BlockSpec((K, tm), lambda i: (0, i)),     # activations: tiled over M
        pl.BlockSpec((Cout, 1), lambda i: (0, 0)),   # per-channel BN shift
    ]
    args = [w.astype(jnp.bfloat16), a.astype(jnp.bfloat16),
            shift.astype(jnp.float32)]
    if residual is not None:
        in_specs.append(pl.BlockSpec((Cout, tm), lambda i: (0, i)))
        args.append(residual.astype(jnp.float32))
    return pl.pallas_call(
        kernel,
        out_shape=jax.ShapeDtypeStruct((Cout, M), jnp.float32),
        grid=grid,
        in_specs=in_specs,
        out_specs=pl.BlockSpec((Cout, tm), lambda i: (0, i)),
        compiler_params=pltpu.CompilerParams(dimension_semantics=("parallel",)),
    )(*args)


# ----------------------------------------------------------------------------
# Pallas kernel 2: fused FC head   out = relu(x@W1 + b1) @ W2 + b2
# ----------------------------------------------------------------------------
def _fc_head_kernel(x_ref, w1_ref, b1_ref, w2_ref, b2_ref, o_ref):
    h = jnp.dot(x_ref[...], w1_ref[...], preferred_element_type=jnp.float32)
    h = jnp.maximum(h + b1_ref[...], 0.0)
    # TODO(synk): nn.Dropout(0.25) is identity in eval/inference mode; not applied.
    out = jnp.dot(h.astype(w2_ref.dtype), w2_ref[...],
                  preferred_element_type=jnp.float32)
    o_ref[...] = out + b2_ref[...]


def fc_head(x, fc1_w, fc1_b, fc2_w, fc2_b):
    B, F = x.shape
    H = fc1_w.shape[0]
    N = fc2_w.shape[0]
    w1 = fc1_w.T.astype(jnp.bfloat16)        # [F, H]
    w2 = fc2_w.T.astype(jnp.bfloat16)        # [H, N]
    return pl.pallas_call(
        _fc_head_kernel,
        out_shape=jax.ShapeDtypeStruct((B, N), jnp.float32),
        grid=(1,),
        in_specs=[
            pl.BlockSpec((B, F), lambda i: (0, 0)),
            pl.BlockSpec((F, H), lambda i: (0, 0)),
            pl.BlockSpec((1, H), lambda i: (0, 0)),
            pl.BlockSpec((H, N), lambda i: (0, 0)),
            pl.BlockSpec((1, N), lambda i: (0, 0)),
        ],
        out_specs=pl.BlockSpec((B, N), lambda i: (0, 0)),
        compiler_params=pltpu.CompilerParams(dimension_semantics=("arbitrary",)),
    )(x.astype(jnp.bfloat16), w1, fc1_b.reshape(1, -1).astype(jnp.float32),
      w2, fc2_b.reshape(1, -1).astype(jnp.float32))


# ----------------------------------------------------------------------------
# Glue: transposed im2col (channel-first, lane axis = B*Ho*Wo), BN folding
# ----------------------------------------------------------------------------
def im2col_t(x_cbhw, kh, kw, stride, pad):
    """x:[C,B,H,W] -> A:[kh*kw*C, B*Ho*Wo]; K order=(i,j,c), M order=(b,ho,wo)."""
    C, B, H, W = x_cbhw.shape
    xp = jnp.pad(x_cbhw, ((0, 0), (0, 0), (pad, pad), (pad, pad)))
    Ho = (H + 2 * pad - kh) // stride + 1
    Wo = (W + 2 * pad - kw) // stride + 1
    cols = []
    for i in range(kh):
        for j in range(kw):
            cols.append(xp[:, :, i:i + stride * Ho:stride, j:j + stride * Wo:stride])
    a = jnp.stack(cols, axis=0).reshape(kh * kw * C, B * Ho * Wo)
    # TODO(synk): im2col is still materialized by XLA (9x activation blow-up);
    # fusing the 9 taps into the kernel via strided BlockSpecs is a further win.
    return a, Ho, Wo


def bn_scale_shift(bn, eps=1e-5):
    gamma, beta, mean, var = bn
    scale = gamma / jnp.sqrt(var + eps)
    shift = beta - mean * scale
    return scale, shift.reshape(-1, 1)


def fold_weight(w_oihw, scale):
    """[Cout,Cin,KH,KW] -> [Cout, KH*KW*Cin] with BN scale folded in."""
    Cout, Cin, KH, KW = w_oihw.shape
    wm = jnp.transpose(w_oihw, (0, 2, 3, 1)).reshape(Cout, KH * KW * Cin)
    return wm * scale[:, None]


def pad_1x1_to_3x3(w):
    Cout, Cin = w.shape[:2]
    w3 = jnp.zeros((Cout, Cin, 3, 3), w.dtype)
    return w3.at[:, :, 1, 1].set(w[:, :, 0, 0])


def residual_block(x_cbhw, p, stride):
    C, B, H, W = x_cbhw.shape
    Cout = p["conv1_w"].shape[0]
    s1, sh1 = bn_scale_shift(p["bn1"])
    a1, Ho, Wo = im2col_t(x_cbhw, 3, 3, stride, 1)            # [9C, B*Ho*Wo]
    if "sc_w" in p:
        # conv1+bn1 and the 1x1 projection shortcut share the same im2col A:
        # fuse them into one GEMM (shortcut zero-padded to the center 3x3 tap).
        ssc, shsc = bn_scale_shift(p["sc_bn"])
        w_fused = jnp.concatenate(
            [fold_weight(p["conv1_w"], s1),
             fold_weight(pad_1x1_to_3x3(p["sc_w"]), ssc)], axis=0)   # [2Cout,9C]
        shift_fused = jnp.concatenate([sh1, shsc], axis=0)           # [2Cout,1]
        out = conv_gemm(w_fused, a1, shift_fused, relu_rows=Cout)    # [2Cout,M]
        out1 = out[:Cout]          # relu(bn1(conv1(x)))
        shortcut = out[Cout:]      # sc_bn(sc_conv(x)), no ReLU
    else:
        out1 = conv_gemm(fold_weight(p["conv1_w"], s1), a1, sh1, relu_rows=Cout)
        shortcut = x_cbhw.reshape(C, B * H * W)                      # identity
    s2, sh2 = bn_scale_shift(p["bn2"])
    a2, Ho2, Wo2 = im2col_t(out1.reshape(Cout, B, Ho, Wo), 3, 3, 1, 1)
    # conv2 + bn2 + residual add + final ReLU fused in the GEMM epilogue
    out2 = conv_gemm(fold_weight(p["conv2_w"], s2), a2, sh2,
                     residual=shortcut, relu_rows=Cout)
    return out2.reshape(Cout, B, Ho2, Wo2)


def cnn_forward(x_nchw, params):
    x = jnp.transpose(x_nchw, (1, 0, 2, 3))                  # [C, B, H, W]
    x = residual_block(x, params["layer1"], 2)
    x = residual_block(x, params["layer2"], 2)
    C, B, H, W = x.shape
    # nn.Flatten on NCHW: flatten per sample in (C, H, W) order.
    feat = jnp.transpose(x, (1, 0, 2, 3)).reshape(B, C * H * W)   # [B, 4096]
    return fc_head(feat, params["fc1_w"], params["fc1_b"],
                   params["fc2_w"], params["fc2_b"])


# ----------------------------------------------------------------------------
# Deterministic parameter init (shapes from the PyTorch module __init__)
# ----------------------------------------------------------------------------
def init_bn(key, c):
    k1, k2, k3, k4 = jax.random.split(key, 4)
    gamma = 1.0 + 0.1 * jax.random.normal(k1, (c,), jnp.float32)
    beta = 0.1 * jax.random.normal(k2, (c,), jnp.float32)
    mean = 0.1 * jax.random.normal(k3, (c,), jnp.float32)
    var = 1.0 + 0.1 * jnp.abs(jax.random.normal(k4, (c,), jnp.float32))
    return (gamma, beta, mean, var)


def init_block(key, cin, cout):
    k = jax.random.split(key, 6)
    return {
        "conv1_w": 0.1 * jax.random.normal(k[0], (cout, cin, 3, 3), jnp.float32),
        "bn1": init_bn(k[1], cout),
        "conv2_w": 0.1 * jax.random.normal(k[2], (cout, cout, 3, 3), jnp.float32),
        "bn2": init_bn(k[3], cout),
        # stride!=1 or cin!=cout in both blocks -> projection shortcut exists
        "sc_w": 0.1 * jax.random.normal(k[4], (cout, cin, 1, 1), jnp.float32),
        "sc_bn": init_bn(k[5], cout),
    }


def init_params(key):
    k = jax.random.split(key, 6)
    return {
        "layer1": init_block(k[0], 3, 8),
        "layer2": init_block(k[1], 8, 16),
        "fc1_w": 0.02 * jax.random.normal(k[2], (128, 4096), jnp.float32),
        "fc1_b": 0.02 * jax.random.normal(k[3], (128,), jnp.float32),
        "fc2_w": 0.02 * jax.random.normal(k[4], (14, 128), jnp.float32),
        "fc2_b": 0.02 * jax.random.normal(k[5], (14,), jnp.float32),
    }


if __name__ == "__main__":
    key = jax.random.PRNGKey(0)
    kx, kp = jax.random.split(key)
    # fc1 expects 4096 = 16ch * (H/4) * (W/4) features -> input must be 64x64
    x = jax.random.normal(kx, (2, 3, 64, 64), jnp.float32)
    params = init_params(kp)
    out = jax.jit(cnn_forward)(x, params)
    out = jax.block_until_ready(out)
    assert out.shape == (2, 14) and out.dtype == jnp.float32
    print("KERNEL_OK")
</pallas_src>

<mosaic_0001>
module attributes {stable_mosaic.version = 11 : i64} {
  func.func @_conv_gemm_kernel(%arg0: i32, %arg1: memref<16x27xbf16, #tpu.memory_space<vmem>>, %arg2: memref<27x512xbf16, #tpu.memory_space<vmem>>, %arg3: memref<16x1xf32, #tpu.memory_space<vmem>>, %arg4: memref<16x512xf32, #tpu.memory_space<vmem>>) attributes {dimension_semantics = [#tpu.dimension_semantics<parallel>], iteration_bounds = array<i64: 4>, scalar_prefetch = 0 : i64, scratch_operands = 0 : i64, tpu.core_type = #tpu.core_type<tc>, window_params = [{pipeline_mode = #tpu.pipeline_mode<synchronous>, transform_indices = @transform_0, window_bounds = array<i64: 16, 27>}, {transform_indices = @transform_1, window_bounds = array<i64: 27, 512>}, {pipeline_mode = #tpu.pipeline_mode<synchronous>, transform_indices = @transform_2, window_bounds = array<i64: 16, 1>}, {transform_indices = @transform_3, window_bounds = array<i64: 16, 512>}]} {
    %c0 = arith.constant 0 : index
    %c0_0 = arith.constant 0 : index
    %0 = vector.load %arg1[%c0, %c0_0] : memref<16x27xbf16, #tpu.memory_space<vmem>>, vector<16x27xbf16>
    %c0_1 = arith.constant 0 : index
    %c0_2 = arith.constant 0 : index
    %1 = vector.load %arg2[%c0_1, %c0_2] : memref<27x512xbf16, #tpu.memory_space<vmem>>, vector<27x512xbf16>
    %cst = arith.constant dense<0.000000e+00> : vector<16x512xf32>
    %2 = tpu.matmul %0, %1, %cst {dimension_numbers = #tpu.dot_dimension_numbers<[1], [0], [0], [1], [0, 0, 1, 1], [], []>} : vector<16x27xbf16>, vector<27x512xbf16>, vector<16x512xf32> -> vector<16x512xf32>
    %c0_3 = arith.constant 0 : index
    %c0_4 = arith.constant 0 : index
    %3 = vector.load %arg3[%c0_3, %c0_4] : memref<16x1xf32, #tpu.memory_space<vmem>>, vector<16x1xf32>
    %4 = vector.broadcast %3 : vector<16x1xf32> to vector<16x512xf32>
    %5 = arith.addf %2, %4 : vector<16x512xf32>
    %6 = tpu.iota {dimensions = array<i32: 0>} : vector<16x512xi32>
    %c8_i32 = arith.constant 8 : i32
    %7 = vector.broadcast %c8_i32 : i32 to vector<16x512xi32>
    %8 = arith.cmpi slt, %6, %7 : vector<16x512xi32>
    %cst_5 = arith.constant 0.000000e+00 : f32
    %9 = vector.broadcast %cst_5 : f32 to vector<16x512xf32>
    %10 = arith.maximumf %5, %9 : vector<16x512xf32>
    %11 = arith.select %8, %10, %5 : vector<16x512xi1>, vector<16x512xf32>
    %c0_6 = arith.constant 0 : index
    %c0_7 = arith.constant 0 : index
    %12 = vector.load %arg4[%c0_6, %c0_7] : memref<16x512xf32, #tpu.memory_space<vmem>>, vector<16x512xf32>
    tpu.vector_store %arg4[%c0_6, %c0_7], %11 {strides = array<i32>} : memref<16x512xf32, #tpu.memory_space<vmem>>, vector<16x512xf32>,
    return
  }
  func.func @transform_0(%arg0: i32) -> (i32, i32) {
    %c0_i32 = arith.constant 0 : i32
    %c0_i32_0 = arith.constant 0 : i32
    %c0_i32_1 = arith.constant 0 : i32
    return %c0_i32, %c0_i32_0 : i32, i32
  }
  func.func @transform_1(%arg0: i32) -> (i32, i32) {
    %c0_i32 = arith.constant 0 : i32
    %c0_i32_0 = arith.constant 0 : i32
    return %c0_i32, %arg0 : i32, i32
  }
  func.func @transform_2(%arg0: i32) -> (i32, i32) {
    %c0_i32 = arith.constant 0 : i32
    %c0_i32_0 = arith.constant 0 : i32
    %c0_i32_1 = arith.constant 0 : i32
    return %c0_i32, %c0_i32_0 : i32, i32
  }
  func.func @transform_3(%arg0: i32) -> (i32, i32) {
    %c0_i32 = arith.constant 0 : i32
    %c0_i32_0 = arith.constant 0 : i32
    return %c0_i32, %arg0 : i32, i32
  }
}

module attributes {stable_mosaic.version = 11 : i64} {
  func.func @_conv_gemm_kernel(%arg0: i32, %arg1: memref<8x72xbf16, #tpu.memory_space<vmem>>, %arg2: memref<72x512xbf16, #tpu.memory_space<vmem>>, %arg3: memref<8x1xf32, #tpu.memory_space<vmem>>, %arg4: memref<8x512xf32, #tpu.memory_space<vmem>>, %arg5: memref<8x512xf32, #tpu.memory_space<vmem>>) attributes {dimension_semantics = [#tpu.dimension_semantics<parallel>], iteration_bounds = array<i64: 4>, scalar_prefetch = 0 : i64, scratch_operands = 0 : i64, tpu.core_type = #tpu.core_type<tc>, window_params = [{pipeline_mode = #tpu.pipeline_mode<synchronous>, transform_indices = @transform_0, window_bounds = array<i64: 8, 72>}, {transform_indices = @transform_1, window_bounds = array<i64: 72, 512>}, {pipeline_mode = #tpu.pipeline_mode<synchronous>, transform_indices = @transform_2, window_bounds = array<i64: 8, 1>}, {transform_indices = @transform_3, window_bounds = array<i64: 8, 512>}, {transform_indices = @transform_4, window_bounds = array<i64: 8, 512>}]} {
    %c0 = arith.constant 0 : index
    %c0_0 = arith.constant 0 : index
    %0 = vector.load %arg1[%c0, %c0_0] : memref<8x72xbf16, #tpu.memory_space<vmem>>, vector<8x72xbf16>
    %c0_1 = arith.constant 0 : index
    %c0_2 = arith.constant 0 : index
    %1 = vector.load %arg2[%c0_1, %c0_2] : memref<72x512xbf16, #tpu.memory_space<vmem>>, vector<72x512xbf16>
    %cst = arith.constant dense<0.000000e+00> : vector<8x512xf32>
    %2 = tpu.matmul %0, %1, %cst {dimension_numbers = #tpu.dot_dimension_numbers<[1], [0], [0], [1], [0, 0, 1, 1], [], []>} : vector<8x72xbf16>, vector<72x512xbf16>, vector<8x512xf32> -> vector<8x512xf32>
    %c0_3 = arith.constant 0 : index
    %c0_4 = arith.constant 0 : index
    %3 = vector.load %arg3[%c0_3, %c0_4] : memref<8x1xf32, #tpu.memory_space<vmem>>, vector<8x1xf32>
    %4 = vector.broadcast %3 : vector<8x1xf32> to vector<8x512xf32>
    %5 = arith.addf %2, %4 : vector<8x512xf32>
    %c0_5 = arith.constant 0 : index
    %c0_6 = arith.constant 0 : index
    %6 = vector.load %arg4[%c0_5, %c0_6] : memref<8x512xf32, #tpu.memory_space<vmem>>, vector<8x512xf32>
    %7 = arith.addf %5, %6 : vector<8x512xf32>
    %cst_7 = arith.constant 0.000000e+00 : f32
    %8 = vector.broadcast %cst_7 : f32 to vector<8x512xf32>
    %9 = arith.maximumf %7, %8 : vector<8x512xf32>
    %c0_8 = arith.constant 0 : index
    %c0_9 = arith.constant 0 : index
    %10 = vector.load %arg5[%c0_8, %c0_9] : memref<8x512xf32, #tpu.memory_space<vmem>>, vector<8x512xf32>
    tpu.vector_store %arg5[%c0_8, %c0_9], %9 {strides = array<i32>} : memref<8x512xf32, #tpu.memory_space<vmem>>, vector<8x512xf32>,
    return
  }
  func.func @transform_0(%arg0: i32) -> (i32, i32) {
    %c0_i32 = arith.constant 0 : i32
    %c0_i32_0 = arith.constant 0 : i32
    %c0_i32_1 = arith.constant 0 : i32
    return %c0_i32, %c0_i32_0 : i32, i32
  }
  func.func @transform_1(%arg0: i32) -> (i32, i32) {
    %c0_i32 = arith.constant 0 : i32
    %c0_i32_0 = arith.constant 0 : i32
    return %c0_i32, %arg0 : i32, i32
  }
  func.func @transform_2(%arg0: i32) -> (i32, i32) {
    %c0_i32 = arith.constant 0 : i32
    %c0_i32_0 = arith.constant 0 : i32
    %c0_i32_1 = arith.constant 0 : i32
    return %c0_i32, %c0_i32_0 : i32, i32
  }
  func.func @transform_3(%arg0: i32) -> (i32, i32) {
    %c0_i32 = arith.constant 0 : i32
    %c0_i32_0 = arith.constant 0 : i32
    return %c0_i32, %arg0 : i32, i32
  }
  func.func @transform_4(%arg0: i32) -> (i32, i32) {
    %c0_i32 = arith.constant 0 : i32
    %c0_i32_0 = arith.constant 0 : i32
    return %c0_i32, %arg0 : i32, i32
  }
}

module attributes {stable_mosaic.version = 11 : i64} {
  func.func @_conv_gemm_kernel(%arg0: i32, %arg1: memref<32x72xbf16, #tpu.memory_space<vmem>>, %arg2: memref<72x256xbf16, #tpu.memory_space<vmem>>, %arg3: memref<32x1xf32, #tpu.memory_space<vmem>>, %arg4: memref<32x256xf32, #tpu.memory_space<vmem>>) attributes {dimension_semantics = [#tpu.dimension_semantics<parallel>], iteration_bounds = array<i64: 2>, scalar_prefetch = 0 : i64, scratch_operands = 0 : i64, tpu.core_type = #tpu.core_type<tc>, window_params = [{pipeline_mode = #tpu.pipeline_mode<synchronous>, transform_indices = @transform_0, window_bounds = array<i64: 32, 72>}, {transform_indices = @transform_1, window_bounds = array<i64: 72, 256>}, {pipeline_mode = #tpu.pipeline_mode<synchronous>, transform_indices = @transform_2, window_bounds = array<i64: 32, 1>}, {transform_indices = @transform_3, window_bounds = array<i64: 32, 256>}]} {
    %c0 = arith.constant 0 : index
    %c0_0 = arith.constant 0 : index
    %0 = vector.load %arg1[%c0, %c0_0] : memref<32x72xbf16, #tpu.memory_space<vmem>>, vector<32x72xbf16>
    %c0_1 = arith.constant 0 : index
    %c0_2 = arith.constant 0 : index
    %1 = vector.load %arg2[%c0_1, %c0_2] : memref<72x256xbf16, #tpu.memory_space<vmem>>, vector<72x256xbf16>
    %cst = arith.constant dense<0.000000e+00> : vector<32x256xf32>
    %2 = tpu.matmul %0, %1, %cst {dimension_numbers = #tpu.dot_dimension_numbers<[1], [0], [0], [1], [0, 0, 1, 1], [], []>} : vector<32x72xbf16>, vector<72x256xbf16>, vector<32x256xf32> -> vector<32x256xf32>
    %c0_3 = arith.constant 0 : index
    %c0_4 = arith.constant 0 : index
    %3 = vector.load %arg3[%c0_3, %c0_4] : memref<32x1xf32, #tpu.memory_space<vmem>>, vector<32x1xf32>
    %4 = vector.broadcast %3 : vector<32x1xf32> to vector<32x256xf32>
    %5 = arith.addf %2, %4 : vector<32x256xf32>
    %6 = tpu.iota {dimensions = array<i32: 0>} : vector<32x256xi32>
    %c16_i32 = arith.constant 16 : i32
    %7 = vector.broadcast %c16_i32 : i32 to vector<32x256xi32>
    %8 = arith.cmpi slt, %6, %7 : vector<32x256xi32>
    %cst_5 = arith.constant 0.000000e+00 : f32
    %9 = vector.broadcast %cst_5 : f32 to vector<32x256xf32>
    %10 = arith.maximumf %5, %9 : vector<32x256xf32>
    %11 = arith.select %8, %10, %5 : vector<32x256xi1>, vector<32x256xf32>
    %c0_6 = arith.constant 0 : index
    %c0_7 = arith.constant 0 : index
    %12 = vector.load %arg4[%c0_6, %c0_7] : memref<32x256xf32, #tpu.memory_space<vmem>>, vector<32x256xf32>
    tpu.vector_store %arg4[%c0_6, %c0_7], %11 {strides = array<i32>} : memref<32x256xf32, #tpu.memory_space<vmem>>, vector<32x256xf32>,
    return
  }
  func.func @transform_0(%arg0: i32) -> (i32, i32) {
    %c0_i32 = arith.constant 0 : i32
    %c0_i32_0 = arith.constant 0 : i32
    %c0_i32_1 = arith.constant 0 : i32
    return %c0_i32, %c0_i32_0 : i32, i32
  }
  func.func @transform_1(%arg0: i32) -> (i32, i32) {
    %c0_i32 = arith.constant 0 : i32
    %c0_i32_0 = arith.constant 0 : i32
    return %c0_i32, %arg0 : i32, i32
  }
  func.func @transform_2(%arg0: i32) -> (i32, i32) {
    %c0_i32 = arith.constant 0 : i32
    %c0_i32_0 = arith.constant 0 : i32
    %c0_i32_1 = arith.constant 0 : i32
    return %c0_i32, %c0_i32_0 : i32, i32
  }
  func.func @transform_3(%arg0: i32) -> (i32, i32) {
    %c0_i32 = arith.constant 0 : i32
    %c0_i32_0 = arith.constant 0 : i32
    return %c0_i32, %arg0 : i32, i32
  }
}

module attributes {stable_mosaic.version = 11 : i64} {
  func.func @_conv_gemm_kernel(%arg0: i32, %arg1: memref<16x144xbf16, #tpu.memory_space<vmem>>, %arg2: memref<144x256xbf16, #tpu.memory_space<vmem>>, %arg3: memref<16x1xf32, #tpu.memory_space<vmem>>, %arg4: memref<16x256xf32, #tpu.memory_space<vmem>>, %arg5: memref<16x256xf32, #tpu.memory_space<vmem>>) attributes {dimension_semantics = [#tpu.dimension_semantics<parallel>], iteration_bounds = array<i64: 2>, scalar_prefetch = 0 : i64, scratch_operands = 0 : i64, tpu.core_type = #tpu.core_type<tc>, window_params = [{pipeline_mode = #tpu.pipeline_mode<synchronous>, transform_indices = @transform_0, window_bounds = array<i64: 16, 144>}, {transform_indices = @transform_1, window_bounds = array<i64: 144, 256>}, {pipeline_mode = #tpu.pipeline_mode<synchronous>, transform_indices = @transform_2, window_bounds = array<i64: 16, 1>}, {transform_indices = @transform_3, window_bounds = array<i64: 16, 256>}, {transform_indices = @transform_4, window_bounds = array<i64: 16, 256>}]} {
    %c0 = arith.constant 0 : index
    %c0_0 = arith.constant 0 : index
    %0 = vector.load %arg1[%c0, %c0_0] : memref<16x144xbf16, #tpu.memory_space<vmem>>, vector<16x144xbf16>
    %c0_1 = arith.constant 0 : index
    %c0_2 = arith.constant 0 : index
    %1 = vector.load %arg2[%c0_1, %c0_2] : memref<144x256xbf16, #tpu.memory_space<vmem>>, vector<144x256xbf16>
    %cst = arith.constant dense<0.000000e+00> : vector<16x256xf32>
    %2 = tpu.matmul %0, %1, %cst {dimension_numbers = #tpu.dot_dimension_numbers<[1], [0], [0], [1], [0, 0, 1, 1], [], []>} : vector<16x144xbf16>, vector<144x256xbf16>, vector<16x256xf32> -> vector<16x256xf32>
    %c0_3 = arith.constant 0 : index
    %c0_4 = arith.constant 0 : index
    %3 = vector.load %arg3[%c0_3, %c0_4] : memref<16x1xf32, #tpu.memory_space<vmem>>, vector<16x1xf32>
    %4 = vector.broadcast %3 : vector<16x1xf32> to vector<16x256xf32>
    %5 = arith.addf %2, %4 : vector<16x256xf32>
    %c0_5 = arith.constant 0 : index
    %c0_6 = arith.constant 0 : index
    %6 = vector.load %arg4[%c0_5, %c0_6] : memref<16x256xf32, #tpu.memory_space<vmem>>, vector<16x256xf32>
    %7 = arith.addf %5, %6 : vector<16x256xf32>
    %cst_7 = arith.constant 0.000000e+00 : f32
    %8 = vector.broadcast %cst_7 : f32 to vector<16x256xf32>
    %9 = arith.maximumf %7, %8 : vector<16x256xf32>
    %c0_8 = arith.constant 0 : index
    %c0_9 = arith.constant 0 : index
    %10 = vector.load %arg5[%c0_8, %c0_9] : memref<16x256xf32, #tpu.memory_space<vmem>>, vector<16x256xf32>
    tpu.vector_store %arg5[%c0_8, %c0_9], %9 {strides = array<i32>} : memref<16x256xf32, #tpu.memory_space<vmem>>, vector<16x256xf32>,
    return
  }
  func.func @transform_0(%arg0: i32) -> (i32, i32) {
    %c0_i32 = arith.constant 0 : i32
    %c0_i32_0 = arith.constant 0 : i32
    %c0_i32_1 = arith.constant 0 : i32
    return %c0_i32, %c0_i32_0 : i32, i32
  }
  func.func @transform_1(%arg0: i32) -> (i32, i32) {
    %c0_i32 = arith.constant 0 : i32
    %c0_i32_0 = arith.constant 0 : i32
    return %c0_i32, %arg0 : i32, i32
  }
  func.func @transform_2(%arg0: i32) -> (i32, i32) {
    %c0_i32 = arith.constant 0 : i32
    %c0_i32_0 = arith.constant 0 : i32
    %c0_i32_1 = arith.constant 0 : i32
    return %c0_i32, %c0_i32_0 : i32, i32
  }
  func.func @transform_3(%arg0: i32) -> (i32, i32) {
    %c0_i32 = arith.constant 0 : i32
    %c0_i32_0 = arith.constant 0 : i32
    return %c0_i32, %arg0 : i32, i32
  }
  func.func @transform_4(%arg0: i32) -> (i32, i32) {
    %c0_i32 = arith.constant 0 : i32
    %c0_i32_0 = arith.constant 0 : i32
    return %c0_i32, %arg0 : i32, i32
  }
}

module attributes {stable_mosaic.version = 11 : i64} {
  func.func @_fc_head_kernel(%arg0: i32, %arg1: memref<2x4096xbf16, #tpu.memory_space<vmem>>, %arg2: memref<4096x128xbf16, #tpu.memory_space<vmem>>, %arg3: memref<1x128xf32, #tpu.memory_space<vmem>>, %arg4: memref<128x14xbf16, #tpu.memory_space<vmem>>, %arg5: memref<1x14xf32, #tpu.memory_space<vmem>>, %arg6: memref<2x14xf32, #tpu.memory_space<vmem>>) attributes {dimension_semantics = [#tpu.dimension_semantics<arbitrary>], iteration_bounds = array<i64: 1>, scalar_prefetch = 0 : i64, scratch_operands = 0 : i64, tpu.core_type = #tpu.core_type<tc>, window_params = [{pipeline_mode = #tpu.pipeline_mode<synchronous>, transform_indices = @transform_0, window_bounds = array<i64: 2, 4096>}, {pipeline_mode = #tpu.pipeline_mode<synchronous>, transform_indices = @transform_1, window_bounds = array<i64: 4096, 128>}, {pipeline_mode = #tpu.pipeline_mode<synchronous>, transform_indices = @transform_2, window_bounds = array<i64: 1, 128>}, {pipeline_mode = #tpu.pipeline_mode<synchronous>, transform_indices = @transform_3, window_bounds = array<i64: 128, 14>}, {pipeline_mode = #tpu.pipeline_mode<synchronous>, transform_indices = @transform_4, window_bounds = array<i64: 1, 14>}, {pipeline_mode = #tpu.pipeline_mode<synchronous>, transform_indices = @transform_5, window_bounds = array<i64: 2, 14>}]} {
    %c0 = arith.constant 0 : index
    %c0_0 = arith.constant 0 : index
    %0 = vector.load %arg1[%c0, %c0_0] : memref<2x4096xbf16, #tpu.memory_space<vmem>>, vector<2x4096xbf16>
    %c0_1 = arith.constant 0 : index
    %c0_2 = arith.constant 0 : index
    %1 = vector.load %arg2[%c0_1, %c0_2] : memref<4096x128xbf16, #tpu.memory_space<vmem>>, vector<4096x128xbf16>
    %cst = arith.constant dense<0.000000e+00> : vector<2x128xf32>
    %2 = tpu.matmul %0, %1, %cst {dimension_numbers = #tpu.dot_dimension_numbers<[1], [0], [0], [1], [0, 0, 1, 1], [], []>} : vector<2x4096xbf16>, vector<4096x128xbf16>, vector<2x128xf32> -> vector<2x128xf32>
    %c0_3 = arith.constant 0 : index
    %c0_4 = arith.constant 0 : index
    %3 = vector.load %arg3[%c0_3, %c0_4] : memref<1x128xf32, #tpu.memory_space<vmem>>, vector<1x128xf32>
    %4 = vector.broadcast %3 : vector<1x128xf32> to vector<2x128xf32>
    %5 = arith.addf %2, %4 : vector<2x128xf32>
    %cst_5 = arith.constant 0.000000e+00 : f32
    %6 = vector.broadcast %cst_5 : f32 to vector<2x128xf32>
    %7 = arith.maximumf %5, %6 : vector<2x128xf32>
    %8 = arith.truncf %7 : vector<2x128xf32> to vector<2x128xbf16>
    %c0_6 = arith.constant 0 : index
    %c0_7 = arith.constant 0 : index
    %9 = vector.load %arg4[%c0_6, %c0_7] : memref<128x14xbf16, #tpu.memory_space<vmem>>, vector<128x14xbf16>
    %cst_8 = arith.constant dense<0.000000e+00> : vector<2x14xf32>
    %10 = tpu.matmul %8, %9, %cst_8 {dimension_numbers = #tpu.dot_dimension_numbers<[1], [0], [0], [1], [0, 0, 1, 1], [], []>} : vector<2x128xbf16>, vector<128x14xbf16>, vector<2x14xf32> -> vector<2x14xf32>
    %c0_9 = arith.constant 0 : index
    %c0_10 = arith.constant 0 : index
    %11 = vector.load %arg5[%c0_9, %c0_10] : memref<1x14xf32, #tpu.memory_space<vmem>>, vector<1x14xf32>
    %12 = vector.broadcast %11 : vector<1x14xf32> to vector<2x14xf32>
    %13 = arith.addf %10, %12 : vector<2x14xf32>
    %c0_11 = arith.constant 0 : index
    %c0_12 = arith.constant 0 : index
    %14 = vector.load %arg6[%c0_11, %c0_12] : memref<2x14xf32, #tpu.memory_space<vmem>>, vector<2x14xf32>
    tpu.vector_store %arg6[%c0_11, %c0_12], %13 {strides = array<i32>} : memref<2x14xf32, #tpu.memory_space<vmem>>, vector<2x14xf32>,
    return
  }
  func.func @transform_0(%arg0: i32) -> (i32, i32) {
    %c0_i32 = arith.constant 0 : i32
    %c0_i32_0 = arith.constant 0 : i32
    %c0_i32_1 = arith.constant 0 : i32
    return %c0_i32, %c0_i32_0 : i32, i32
  }
  func.func @transform_1(%arg0: i32) -> (i32, i32) {
    %c0_i32 = arith.constant 0 : i32
    %c0_i32_0 = arith.constant 0 : i32
    %c0_i32_1 = arith.constant 0 : i32
    return %c0_i32, %c0_i32_0 : i32, i32
  }
  func.func @transform_2(%arg0: i32) -> (i32, i32) {
    %c0_i32 = arith.constant 0 : i32
    %c0_i32_0 = arith.constant 0 : i32
    %c0_i32_1 = arith.constant 0 : i32
    return %c0_i32, %c0_i32_0 : i32, i32
  }
  func.func @transform_3(%arg0: i32) -> (i32, i32) {
    %c0_i32 = arith.constant 0 : i32
    %c0_i32_0 = arith.constant 0 : i32
    %c0_i32_1 = arith.constant 0 : i32
    return %c0_i32, %c0_i32_0 : i32, i32
  }
  func.func @transform_4(%arg0: i32) -> (i32, i32) {
    %c0_i32 = arith.constant 0 : i32
    %c0_i32_0 = arith.constant 0 : i32
    %c0_i32_1 = arith.constant 0 : i32
    return %c0_i32, %c0_i32_0 : i32, i32
  }
  func.func @transform_5(%arg0: i32) -> (i32, i32) {
    %c0_i32 = arith.constant 0 : i32
    %c0_i32_0 = arith.constant 0 : i32
    %c0_i32_1 = arith.constant 0 : i32
    return %c0_i32, %c0_i32_0 : i32, i32
  }
}

</mosaic_0001>

<bundles_post_ra>
// kernel: cnn_forward.5
= control target key start
LH: loop header
LB: loop body
LE: loop exit
PB: predicated region body
PF: predicated region fallthrough
CT: control target
= control target key end

     0   :  { %s611_s12 = smov 0   ;;  %s613_s13 = smov 0   ;;  %s702_s0 = inlined_call_operand.vmem [shape: bf16[16,27], index: 0, kind: input, shape index: {}]   ;;  %s703_s1 = inlined_call_operand.vmem [shape: bf16[27,2048], index: 1, kind: input, shape index: {}]   ;;  %s704_s2 = inlined_call_operand.vmem [shape: f32[16,1], index: 2, kind: input, shape index: {}]   ;;  %s705_s3 = inlined_call_operand.vmem [shape: f32[16,2048], index: 3, kind: output, shape index: {}]  }
   0x1   :  { %s615_s14 = smov 0  }
   0x2 LB: > { %s497_s15 = sadd.s32 4294967295, %s587_s14   ;;  %s628_s16 = sadd.s32 1, %s587_s14   ;;  %s587_s14 = sphi %s615_s14, %s709_s14   ;;  %s583_s13 = sphi %s613_s13, %s708_s13   ;;  %s579_s12 = sphi %s611_s12, %s707_s12  }
   0x3   : > { %s38_s17 = ssub.s32 %s587_s14, %s628_s16  ;;  %s41_s18 = sadd.s32 1, %s583_s13 }
   0x4   : > { %p39_p0 = scmp.eq.s32.totalorder %s38_s17, 0  ;;  %p48_p1 = scmp.ne.s32.totalorder %s583_s13, %s579_s12 }
   0x5   : > { %p49_p2 = scmp.eq.s32.totalorder %s587_s14, 0  ;;  %p99_p3 = scmp.eq.s32.totalorder %s497_s15, 3 }
   0x6   : > { %s639_s19 = scalar_select %p39_p0, %s583_s13, %s41_s18  }
   0x7   : > { %p50_p4 = por %p49_p2, %p48_p1  ;;  %p641_p5 = por %p99_p3, %p48_p1 }
   0x8   : > { %p500_p6 = scmp.ge.s32.totalorder %s587_s14, 4 }
   0xa   : > { %127 = sbr.rel (%p500_p6) target bundleno = 23 (0x17), region = 24 }
   0xf   : > { %130 = sbr.rel (!%p50_p4) target bundleno = 23 (0x17), region = 28  ;;  %s132_s21 = sand.u32 (%p50_p4), 1, %s583_s13  }
  0x10   : > { %s523_s22 = sshll.u32 (%p50_p4), %s587_s14, 4  ;;  %s501_s23 = sshll.u32 (%p50_p4), %s132_s21, 6 }
  0x11   : > { %s137_s26 = scalar_lea.vmem (%p50_p4), %s703_s1, %s523_s22  ;;  %s134_s27 = scalar_lea.vmem (%p50_p4), [#allocation2], %s501_s23 }
  0x12   : > { %v150_v0 = vld [vmem:[%s137_s26] sm:$0xff] (%p50_p4)  ;;  %v152_v1 = vld [vmem:[%s137_s26 + $0x8] sm:$0xff] (%p50_p4) }
  0x13   : > { %v154_v2 = vld [vmem:[%s137_s26 + $0x40] sm:$0xff] (%p50_p4)  ;;  %151 = vst [vmem:[%s134_s27] sm:$0xff] (%p50_p4), %v150_v0  ;;  %153 = vst [vmem:[%s134_s27 + $0x8] sm:$0xff] (%p50_p4), %v152_v1  ;;  %v156_v3 = vld [vmem:[%s137_s26 + $0x48] sm:$0xff] (%p50_p4) }
  0x14   : > { %155 = vst [vmem:[%s134_s27 + $0x10] sm:$0xff] %v154_v2  ;;  %v158_v4 = vld [vmem:[%s137_s26 + $0x80] sm:$0xff]  ;;  %v160_v5 = vld [vmem:[%s137_s26 + $0x88] sm:$0xff]  ;;  %157 = vst [vmem:[%s134_s27 + $0x18] sm:$0xff] %v156_v3 }
  0x15   : > { %159 = vst [vmem:[%s134_s27 + $0x20] sm:$0xff] %v158_v4  ;;  %161 = vst [vmem:[%s134_s27 + $0x28] sm:$0xff] %v160_v5  ;;  %v162_v6 = vld [vmem:[%s137_s26 + $0xc0] sm:$0xff]  ;;  %v164_v7 = vld [vmem:[%s137_s26 + $0xc8] sm:$0xff] }
  0x16   : > { %163 = vst [vmem:[%s134_s27 + $0x30] sm:$0xff] %v162_v6  ;;  %165 = vst [vmem:[%s134_s27 + $0x38] sm:$0xff] %v164_v7 }
  0x17 PF: > { %p504_p7 = scmp.ge.s32.totalorder %s587_s14, 1  ;;  %p170_p8 = scmp.lt.s32.totalorder %s587_s14, 5 }
  0x19   : > { %p171_p9 = pnand %p504_p7, %p170_p8 }
  0x1a   : > { %s177_s28 = sand.u32 (!%p171_p9), 1, %s579_s12  }
  0x1b   : > { %174 = sbr.rel (%p171_p9) target bundleno = 255 (0xff), region = 51  ;;  %s654_s29 = sshll.u32 (!%p171_p9), %s177_s28, 6 }
  0x1c   : > { %s179_s7 = scalar_lea.vmem (!%p171_p9), [#allocation2], %s654_s29  ;;  %s667_s10 = scalar_lea.vmem (!%p171_p9), [#allocation3], %s654_s29 }
  0x20   : > { %vm269_vm0 = vcmask 1044480   ;;  %vm270_vm1 = vcmask 1045504   ;;  %v589_v8 = vmov 65535   ;;  %v590_v10 = vmov 0   ;;  %v212_v12 = vld [vmem:[%s704_s2] sm:$0xff]  ;;  %v213_v13 = vld [vmem:[%s704_s2 + $0x8] sm:$0xff] }
  0x21   : > { %v271_v9 = vsel %vm269_vm0, 4294967295, %v589_v8  ;;  %317 = vmatprep.mubr.bf16.mxu0 %v590_v10  ;;  %360 = vmatprep.mubr.bf16.mxu1 %v590_v10  ;;  %v552_v14 = vld [vmem:[%s179_s7 + $0x24] ss:$16 sps:$4 sm:$0x3f]   ;;  %v560_v23 = vld [vmem:[%s179_s7 + $0xc] ss:$16 sps:$4 sm:$0xff]  }
  0x22   : > { %v272_v11 = vsel %vm270_vm1, %v271_v9, 0  ;;  %551 = vset.pattern.permute.xlu0 %v590_v10  ;;  %v554_v15 = vld [vmem:[%s179_s7 + $0x2c] ss:$16 sps:$4 sm:$0x3f]   ;;  %v558_v20 = vld [vmem:[%s179_s7 + $0x4] ss:$16 sps:$4 sm:$0xff]  }
  0x23   : > { %216 = vperm.xlu0 %551, %v212_v12   ;;  %v277_v16 = vand.u32 %v552_v14, %v272_v11  ;;  %v556_v17 = vld [vmem:[%s179_s7 + $0x20] ss:$16 sps:$4 sm:$0x3f]   ;;  %v557_v18 = vld [vmem:[%s179_s7 + $0x28] ss:$16 sps:$4 sm:$0x3f]   ;;  %v283_v19 = vand.u32 %v554_v15, %v272_v11 }
  0x24   : > { %v274_v21 = vand.u32 %v556_v17, %v272_v11  ;;  %v280_v22 = vand.u32 %v557_v18, %v272_v11  ;;  %v562_v24 = vld [vmem:[%s179_s7] ss:$16 sps:$4 sm:$0xff]   ;;  %v563_v25 = vld [vmem:[%s179_s7 + $0x8] ss:$16 sps:$4 sm:$0xff]   ;;  %vm265_vm2 = vcmask 220160   ;;  %s524_s11 = sshll.u32 (%p641_p5), %s497_s15, 5 }
  0x25   : > { %297 = vmatprep.subr.bf16.mxu0 %v277_v16  ;;  %340 = vmatprep.subr.bf16.mxu1 %v283_v19  ;;  %v564_v26 = vld [vmem:[%s702_s0] sm:$0xff]   ;;  %s409_s18 = scalar_lea.vmem (%p641_p5), %s705_s3, %s524_s11 }
  0x26   : > { %298 = vmatpush1.bf16.msra.mxu0 %v274_v21  ;;  %341 = vmatpush1.bf16.msra.mxu1 %v280_v22 }
  0x27   : > { %221 = vperm.xlu0 %551, %v213_v13   ;;  %299 = vmatprep.subr.bf16.mxu0 %v558_v20 }
  0x28   : > { %342 = vmatprep.subr.bf16.mxu1 %v560_v23 }
  0x2a   : > { %300 = vmatpush1.bf16.msra.mxu0 %v562_v24  ;;  %343 = vmatpush1.bf16.msra.mxu1 %v563_v25 }
  0x2d   : > { %516 = vmatmul.mubr.msk.bf16.vlgmr.msra.gmra.mxu0 %vm265_vm2, %v564_v26  ;;  %517 = vmatmul.mubr.msk.bf16.vlgmr.msra.gmra.mxu1 %vm265_vm2, %v564_v26 }
  0x9e   : > { %v217_v27 = vpop.permute.xlu0 %216 }
  0xa2   : > { %v222_v36 = vpop.permute.xlu0 %221 }
  0xed   : > { %v319_v28 = vpop.f32.mrf.mxu0  ;;  %v362_v29 = vpop.f32.mrf.mxu1 }
  0xee   : > { %v320_v30 = vadd.f32 %v319_v28, %v217_v27  ;;  %v363_v31 = vadd.f32 %v362_v29, %v217_v27 }
  0xef   : > { %v321_v32 = vpop.f32.mrf.mxu0  ;;  %v364_v33 = vpop.f32.mrf.mxu1 }
  0xf0   : > { %v376_v34 = vmax.f32 %v320_v30, 0.0  ;;  %v378_v35 = vmax.f32 %v363_v31, 0.0  ;;  %v322_v37 = vadd.f32 %v321_v32, %v217_v27  ;;  %v365_v38 = vadd.f32 %v364_v33, %v217_v27 }
  0xf1   : > { %v323_v39 = vpop.f32.mrf.mxu0  ;;  %v366_v40 = vpop.f32.mrf.mxu1 }
  0xf2   : > { %392 = vst [vmem:[%s667_s10] sm:$0xff] %v376_v34  ;;  %394 = vst [vmem:[%s667_s10 + $0x10] sm:$0xff] %v378_v35  ;;  %v377_v41 = vmax.f32 %v322_v37, 0.0  ;;  %v379_v42 = vmax.f32 %v365_v38, 0.0  ;;  %v324_v43 = vadd.f32 %v323_v39, %v222_v36  ;;  %v367_v44 = vadd.f32 %v366_v40, %v222_v36  ;;  %406 = sbr.rel (!%p641_p5) target bundleno = 255 (0xff), region = 59 }
  0xf3   : > { %v325_v45 = vpop.f32.mrf.mxu0  ;;  %v368_v46 = vpop.f32.mrf.mxu1 }
  0xf4   : > { %393 = vst [vmem:[%s667_s10 + $0x8] sm:$0xff] %v377_v41  ;;  %395 = vst [vmem:[%s667_s10 + $0x18] sm:$0xff] %v379_v42  ;;  %v326_v47 = vadd.f32 %v325_v45, %v222_v36  ;;  %v369_v48 = vadd.f32 %v368_v46, %v222_v36 }
  0xf5   : > { %396 = vst [vmem:[%s667_s10 + $0x20] sm:$0xff] %v324_v43  ;;  %398 = vst [vmem:[%s667_s10 + $0x30] sm:$0xff] %v367_v44 }
  0xf6   : > { %397 = vst [vmem:[%s667_s10 + $0x28] sm:$0xff] %v326_v47  ;;  %399 = vst [vmem:[%s667_s10 + $0x38] sm:$0xff] %v369_v48 }
  0xf9   : > { %v422_v49 = vld [vmem:[%s667_s10] sm:$0xff]  ;;  %v426_v51 = vld [vmem:[%s667_s10 + $0x10] sm:$0xff] }
  0xfa   : > { %423 = vst [vmem:[%s409_s18] sm:$0xff] %v422_v49  ;;  %427 = vst [vmem:[%s409_s18 + $0x10] sm:$0xff] %v426_v51 }
  0xfb   : > { %v424_v50 = vld [vmem:[%s667_s10 + $0x8] sm:$0xff]  ;;  %v428_v52 = vld [vmem:[%s667_s10 + $0x18] sm:$0xff] }
  0xfc   : > { %v430_v53 = vld [vmem:[%s667_s10 + $0x20] sm:$0xff]  ;;  %425 = vst [vmem:[%s409_s18 + $0x8] sm:$0xff] %v424_v50  ;;  %429 = vst [vmem:[%s409_s18 + $0x18] sm:$0xff] %v428_v52  ;;  %v434_v55 = vld [vmem:[%s667_s10 + $0x30] sm:$0xff] }
  0xfd   : > { %v432_v54 = vld [vmem:[%s667_s10 + $0x28] sm:$0xff]  ;;  %431 = vst [vmem:[%s409_s18 + $0x80] sm:$0xff] %v430_v53  ;;  %v436_v56 = vld [vmem:[%s667_s10 + $0x38] sm:$0xff]  ;;  %435 = vst [vmem:[%s409_s18 + $0x90] sm:$0xff] %v434_v55 }
  0xfe   : > { %433 = vst [vmem:[%s409_s18 + $0x88] sm:$0xff] %v432_v54  ;;  %437 = vst [vmem:[%s409_s18 + $0x98] sm:$0xff] %v436_v56 }
  0xff PF: > { %p10_p10 = scmp.ge.s32.totalorder %s628_s16, 6   ;;  %s707_s12 = smov %s583_s13 }
 0x100   : > { %s708_s13 = smov %s639_s19  ;;  %s709_s14 = smov %s628_s16 }
 0x101   :  { %12 = sbr.rel (!%p10_p10) target bundleno = 2 (0x2), region = 113 }

// kernel: cnn_forward.6
= control target key start
LH: loop header
LB: loop body
LE: loop exit
PB: predicated region body
PF: predicated region fallthrough
CT: control target
= control target key end

     0   :  { %s725_s15 = smov 0   ;;  %s727_s16 = smov 0   ;;  %s826_s0 = inlined_call_operand.vmem [shape: bf16[8,72], index: 0, kind: input, shape index: {}]   ;;  %s827_s1 = inlined_call_operand.vmem [shape: bf16[72,2048], index: 1, kind: input, shape index: {}]   ;;  %s828_s2 = inlined_call_operand.vmem [shape: f32[8,1], index: 2, kind: input, shape index: {}]   ;;  %s829_s3 = inlined_call_operand.vmem [shape: f32[8,2048], index: 3, kind: input, shape index: {}]   ;;  %s830_s4 = inlined_call_operand.vmem [shape: f32[8,2048], index: 4, kind: output, shape index: {}]  }
   0x1   :  { %s729_s17 = smov 0  }
   0x2 LB: > { %s581_s18 = sadd.s32 4294967295, %s697_s17   ;;  %s742_s19 = sadd.s32 1, %s697_s17   ;;  %s697_s17 = sphi %s729_s17, %s833_s17   ;;  %s693_s16 = sphi %s727_s16, %s832_s16   ;;  %s689_s15 = sphi %s725_s15, %s831_s15  }
   0x3   : > { %s39_s20 = ssub.s32 %s697_s17, %s742_s19  ;;  %s42_s21 = sadd.s32 1, %s693_s16 }
   0x4   : > { %p40_p0 = scmp.eq.s32.totalorder %s39_s20, 0  ;;  %p49_p1 = scmp.ne.s32.totalorder %s693_s16, %s689_s15 }
   0x5   : > { %p50_p2 = scmp.eq.s32.totalorder %s697_s17, 0  ;;  %p584_p4 = scmp.ge.s32.totalorder %s697_s17, 4 }
   0x6   : > { %s751_s22 = scalar_select %p40_p0, %s693_s16, %s42_s21  }
   0x7   : > { %p51_p3 = por %p50_p2, %p49_p1  ;;  %154 = sbr.rel (%p584_p4) target bundleno = 25 (0x19), region = 24 }
   0xc   : > { %157 = sbr.rel (!%p51_p3) target bundleno = 25 (0x19), region = 28  ;;  %s159_s23 = sand.u32 (%p51_p3), 1, %s693_s16  }
   0xd   : > { %s618_s24 = sshll.u32 (%p51_p3), %s697_s17, 4  ;;  %s619_s25 = smul.u32 (%p51_p3), 144, %s159_s23 }
   0xe   : > { %s759_s28 = scalar_lea.vmem (%p51_p3), %s827_s1, %s618_s24 }
   0xf   : > { %v177_v0 = vld [vmem:[%s759_s28] sm:$0xff] (%p51_p3)  ;;  %v179_v1 = vld [vmem:[%s759_s28 + $0x8] sm:$0xff] (%p51_p3)  ;;  %s161_s29 = scalar_lea.vmem (%p51_p3), [#allocation2], %s619_s25 }
  0x10   : > { %v181_v2 = vld [vmem:[%s759_s28 + $0x40] sm:$0xff] (%p51_p3)  ;;  %v183_v3 = vld [vmem:[%s759_s28 + $0x48] sm:$0xff] (%p51_p3)  ;;  %178 = vst [vmem:[%s161_s29] sm:$0xff] (%p51_p3), %v177_v0  ;;  %180 = vst [vmem:[%s161_s29 + $0x8] sm:$0xff] (%p51_p3), %v179_v1 }
  0x11   : > { %v185_v4 = vld [vmem:[%s759_s28 + $0x80] sm:$0xff]  ;;  %v187_v5 = vld [vmem:[%s759_s28 + $0x88] sm:$0xff]  ;;  %182 = vst [vmem:[%s161_s29 + $0x10] sm:$0xff] %v181_v2  ;;  %184 = vst [vmem:[%s161_s29 + $0x18] sm:$0xff] %v183_v3 }
  0x12   : > { %186 = vst [vmem:[%s161_s29 + $0x20] sm:$0xff] %v185_v4  ;;  %188 = vst [vmem:[%s161_s29 + $0x28] sm:$0xff] %v187_v5  ;;  %v189_v6 = vld [vmem:[%s759_s28 + $0xc0] sm:$0xff]  ;;  %v191_v7 = vld [vmem:[%s759_s28 + $0xc8] sm:$0xff] }
  0x13   : > { %v193_v8 = vld [vmem:[%s759_s28 + $0x100] sm:$0xff]  ;;  %190 = vst [vmem:[%s161_s29 + $0x30] sm:$0xff] %v189_v6  ;;  %192 = vst [vmem:[%s161_s29 + $0x38] sm:$0xff] %v191_v7  ;;  %v195_v9 = vld [vmem:[%s759_s28 + $0x108] sm:$0xff] }
  0x14   : > { %194 = vst [vmem:[%s161_s29 + $0x40] sm:$0xff] %v193_v8  ;;  %v197_v10 = vld [vmem:[%s759_s28 + $0x140] sm:$0xff]  ;;  %v199_v11 = vld [vmem:[%s759_s28 + $0x148] sm:$0xff]  ;;  %196 = vst [vmem:[%s161_s29 + $0x48] sm:$0xff] %v195_v9 }
  0x15   : > { %198 = vst [vmem:[%s161_s29 + $0x50] sm:$0xff] %v197_v10  ;;  %200 = vst [vmem:[%s161_s29 + $0x58] sm:$0xff] %v199_v11  ;;  %v201_v12 = vld [vmem:[%s759_s28 + $0x180] sm:$0xff]  ;;  %v203_v13 = vld [vmem:[%s759_s28 + $0x188] sm:$0xff] }
  0x16   : > { %v205_v14 = vld [vmem:[%s759_s28 + $0x1c0] sm:$0xff]  ;;  %202 = vst [vmem:[%s161_s29 + $0x60] sm:$0xff] %v201_v12  ;;  %204 = vst [vmem:[%s161_s29 + $0x68] sm:$0xff] %v203_v13  ;;  %v207_v15 = vld [vmem:[%s759_s28 + $0x1c8] sm:$0xff] }
  0x17   : > { %206 = vst [vmem:[%s161_s29 + $0x70] sm:$0xff] %v205_v14  ;;  %v209_v16 = vld [vmem:[%s759_s28 + $0x200] sm:$0xff]  ;;  %v211_v17 = vld [vmem:[%s759_s28 + $0x208] sm:$0xff]  ;;  %208 = vst [vmem:[%s161_s29 + $0x78] sm:$0xff] %v207_v15 }
  0x18   : > { %210 = vst [vmem:[%s161_s29 + $0x80] sm:$0xff] %v209_v16  ;;  %212 = vst [vmem:[%s161_s29 + $0x88] sm:$0xff] %v211_v17 }
  0x19 PF: > { %p587_p5 = scmp.ge.s32.totalorder %s697_s17, 1  ;;  %p226_p6 = scmp.lt.s32.totalorder %s697_s17, 5 }
  0x1b   : > { %p227_p7 = pnand %p587_p5, %p226_p6 }
  0x1c   : > { %s233_s30 = sand.u32 (!%p227_p7), 1, %s689_s15   ;;  %s588_s11 = sshll.u32 (!%p227_p7), %s581_s18, 2 }
  0x1d   : > { %230 = sbr.rel (%p227_p7) target bundleno = 260 (0x104), region = 55  ;;  %p265_p8 = scmp.lt.s32.totalorder (!%p227_p7), %s588_s11, 15 }
  0x1e   : > { %s620_s5 = smul.u32 (!%p227_p7), 144, %s233_s30 }
  0x20   : > { %s785_s8 = scalar_lea.vmem (!%p227_p7), [#allocation2], %s620_s5 }
  0x22   : > { %v699_v18 = vmov 0   ;;  %v296_v19 = vld [vmem:[%s828_s2] sm:$0xff]  ;;  %vm396_vm0 = vcmask 1043456   ;;  %v295_v21 = vld [vmem:[%s785_s8 + $0x88] sm:$0xff]  ;;  %vm392_vm1 = vcmask 588800   ;;  %s835_s11 = smov (!%p265_p8, %s588_s11), 15 }
  0x23   : > { %441 = vmatprep.mubr.bf16.mxu0 %v699_v18  ;;  %482 = vmatprep.mubr.bf16.mxu1 %v699_v18  ;;  %v294_v20 = vld [vmem:[%s785_s8 + $0x80] sm:$0xff]  ;;  %v611_v23 = vcombine.high %v295_v21, %v295_v21  ;;  %v610_v25 = vcombine.low %v295_v21, %v295_v21  ;;  %v653_v27 = vld [vmem:[%s785_s8 + $0x6c] ss:$16 sps:$4 sm:$0xff]   ;;  %v656_v31 = vld [vmem:[%s785_s8 + $0x68] ss:$16 sps:$4 sm:$0xff]   ;;  %s589_s12 = sshll.u32 %s835_s11, 3 }
  0x24   : > { %646 = vset.pattern.permute.xlu0 %v699_v18  ;;  %v609_v22 = vcombine.high %v294_v20, %v294_v20  ;;  %v608_v24 = vcombine.low %v294_v20, %v294_v20  ;;  %v651_v26 = vld [vmem:[%s785_s8 + $0x64] ss:$16 sps:$4 sm:$0xff]   ;;  %v655_v30 = vld [vmem:[%s785_s8 + $0x60] ss:$16 sps:$4 sm:$0xff]   ;;  %v659_v33 = vld [vmem:[%s785_s8 + $0x4c] ss:$16 sps:$4 sm:$0xff]   ;;  %s268_s15 = scalar_lea.vmem %s829_s3, %s589_s12  ;;  %s274_s20 = scalar_lea.vmem %s830_s4, %s589_s12 }
  0x25   : > { %299 = vperm.xlu0 %646, %v296_v19   ;;  %614 = vmatprep.subr.msk.bf16.mxu1 %vm396_vm0, %v611_v23  ;;  %v404_v29 = vsel %vm396_vm0, %v610_v25, 0  ;;  %v657_v32 = vld [vmem:[%s785_s8 + $0x44] ss:$16 sps:$4 sm:$0xff]   ;;  %v661_v34 = vld [vmem:[%s785_s8 + $0x40] ss:$16 sps:$4 sm:$0xff]   ;;  %v492_v53 = vld [vmem:[%s268_s15 + $0x8] sm:$0xff] }
  0x26   : > { %612 = vmatprep.subr.msk.bf16.mxu0 %vm396_vm0, %v609_v22  ;;  %v398_v28 = vsel %vm396_vm0, %v608_v24, 0  ;;  %457 = vmatpush1.bf16.msra.mxu1 %v404_v29  ;;  %v662_v35 = vld [vmem:[%s785_s8 + $0x48] ss:$16 sps:$4 sm:$0xff]   ;;  %v663_v36 = vld [vmem:[%s785_s8 + $0x24] ss:$16 sps:$4 sm:$0xff]  }
  0x27   : > { %416 = vmatpush1.bf16.msra.mxu0 %v398_v28  ;;  %458 = vmatprep.subr.bf16.mxu1 %v653_v27  ;;  %v665_v37 = vld [vmem:[%s785_s8 + $0x2c] ss:$16 sps:$4 sm:$0xff]   ;;  %v667_v38 = vld [vmem:[%s785_s8 + $0x20] ss:$16 sps:$4 sm:$0xff]   ;;  %v668_v39 = vld [vmem:[%s785_s8 + $0x28] ss:$16 sps:$4 sm:$0xff]  }
  0x28   : > { %417 = vmatprep.subr.bf16.mxu0 %v651_v26  ;;  %v669_v40 = vld [vmem:[%s785_s8 + $0x4] ss:$16 sps:$4 sm:$0xff]   ;;  %v671_v41 = vld [vmem:[%s785_s8 + $0xc] ss:$16 sps:$4 sm:$0xff]   ;;  %v673_v42 = vld [vmem:[%s785_s8] ss:$16 sps:$4 sm:$0xff]  }
  0x29   : > { %v674_v43 = vld [vmem:[%s785_s8 + $0x8] ss:$16 sps:$4 sm:$0xff]   ;;  %v277_v44 = vld [vmem:[%s826_s0] sm:$0xf]  ;;  %v493_v49 = vld [vmem:[%s268_s15 + $0x10] sm:$0xff] }
  0x2a   : > { %459 = vmatpush1.bf16.msra.mxu1 %v656_v31  ;;  %v491_v47 = vld [vmem:[%s268_s15] sm:$0xff]  ;;  %v494_v55 = vld [vmem:[%s268_s15 + $0x18] sm:$0xff] }
  0x2b   : > { %418 = vmatpush1.bf16.msra.mxu0 %v655_v30  ;;  %460 = vmatprep.subr.bf16.mxu1 %v659_v33 }
  0x2c   : > { %419 = vmatprep.subr.bf16.mxu0 %v657_v32 }
  0x2e   : > { %461 = vmatpush1.bf16.msra.mxu1 %v662_v35 }
  0x2f   : > { %420 = vmatpush1.bf16.msra.mxu0 %v661_v34  ;;  %462 = vmatprep.subr.bf16.mxu1 %v665_v37 }
  0x30   : > { %421 = vmatprep.subr.bf16.mxu0 %v663_v36 }
  0x32   : > { %463 = vmatpush1.bf16.msra.mxu1 %v668_v39 }
  0x33   : > { %422 = vmatpush1.bf16.msra.mxu0 %v667_v38  ;;  %464 = vmatprep.subr.bf16.mxu1 %v671_v41 }
  0x34   : > { %423 = vmatprep.subr.bf16.mxu0 %v669_v40 }
  0x36   : > { %465 = vmatpush1.bf16.msra.mxu1 %v674_v43 }
  0x37   : > { %424 = vmatpush1.bf16.msra.mxu0 %v673_v42 }
  0x39   : > { %615 = vmatmul.mubr.msk.bf16.vlgmr.msra.gmra.mxu1 %vm392_vm1, %v277_v44 }
  0x3a   : > { %613 = vmatmul.mubr.msk.bf16.vlgmr.msra.gmra.mxu0 %vm392_vm1, %v277_v44 }
  0xa0   : > { %v300_v45 = vpop.permute.xlu0 %299 }
  0xf9   : > { %v484_v48 = vpop.f32.mrf.mxu1 }
  0xfa   : > { %v443_v46 = vpop.f32.mrf.mxu0  ;;  %v485_v51 = vadd.f32 %v484_v48, %v300_v45 }
  0xfb   : > { %v444_v50 = vadd.f32 %v443_v46, %v300_v45  ;;  %v486_v54 = vpop.f32.mrf.mxu1 }
  0xfc   : > { %v445_v52 = vpop.f32.mrf.mxu0  ;;  %v497_v57 = vadd.f32 %v493_v49, %v485_v51  ;;  %v487_v59 = vadd.f32 %v486_v54, %v300_v45 }
  0xfd   : > { %v495_v56 = vadd.f32 %v491_v47, %v444_v50  ;;  %v446_v58 = vadd.f32 %v445_v52, %v300_v45  ;;  %v488_v61 = vpop.f32.mrf.mxu1 }
  0xfe   : > { %v447_v60 = vpop.f32.mrf.mxu0  ;;  %v501_v63 = vmax.f32 %v497_v57, 0.0  ;;  %v498_v1 = vadd.f32 %v494_v55, %v487_v59 }
  0xff   : > { %v499_v62 = vmax.f32 %v495_v56, 0.0  ;;  %v496_v0 = vadd.f32 %v492_v53, %v446_v58  ;;  %v489_v3 = vpop.f32.mrf.mxu1 }
 0x100   : > { %v448_v2 = vpop.f32.mrf.mxu0  ;;  %505 = vst [vmem:[%s274_s20 + $0x10] sm:$0xff] %v501_v63  ;;  %v502_v5 = vmax.f32 %v498_v1, 0.0 }
 0x101   : > { %503 = vst [vmem:[%s274_s20] sm:$0xff] %v499_v62  ;;  %v500_v4 = vmax.f32 %v496_v0, 0.0 }
 0x102   : > { %506 = vst [vmem:[%s274_s20 + $0x18] sm:$0xff] %v502_v5 }
 0x103   : > { %504 = vst [vmem:[%s274_s20 + $0x8] sm:$0xff] %v500_v4 }
 0x104 PF: > { %p11_p9 = scmp.ge.s32.totalorder %s742_s19, 6   ;;  %s831_s15 = smov %s693_s16 }
 0x105   : > { %s832_s16 = smov %s751_s22  ;;  %s833_s17 = smov %s742_s19 }
 0x106   :  { %13 = sbr.rel (!%p11_p9) target bundleno = 2 (0x2), region = 97 }

// kernel: cnn_forward.7
= control target key start
LH: loop header
LB: loop body
LE: loop exit
PB: predicated region body
PF: predicated region fallthrough
CT: control target
= control target key end

     0   :  { %s655_s12 = smov 0   ;;  %s657_s13 = smov 0   ;;  %s766_s0 = inlined_call_operand.vmem [shape: bf16[32,72], index: 0, kind: input, shape index: {}]   ;;  %s767_s1 = inlined_call_operand.vmem [shape: bf16[72,512], index: 1, kind: input, shape index: {}]   ;;  %s768_s2 = inlined_call_operand.vmem [shape: f32[32,1], index: 2, kind: input, shape index: {}]   ;;  %s769_s3 = inlined_call_operand.vmem [shape: f32[32,512], index: 3, kind: output, shape index: {}]  }
   0x1   :  { %s659_s14 = smov 0  }
   0x2 LB: > { %s525_s15 = sadd.s32 4294967295, %s632_s14   ;;  %s672_s16 = sadd.s32 1, %s632_s14   ;;  %s632_s14 = sphi %s659_s14, %s773_s14   ;;  %s628_s13 = sphi %s657_s13, %s772_s13   ;;  %s624_s12 = sphi %s655_s12, %s771_s12  }
   0x3   : > { %s38_s17 = ssub.s32 %s632_s14, %s672_s16  ;;  %s41_s18 = sadd.s32 1, %s628_s13 }
   0x4   : > { %p39_p0 = scmp.eq.s32.totalorder %s38_s17, 0  ;;  %p48_p1 = scmp.ne.s32.totalorder %s628_s13, %s624_s12 }
   0x5   : > { %p49_p2 = scmp.eq.s32.totalorder %s632_s14, 0  ;;  %p99_p3 = scmp.eq.s32.totalorder %s525_s15, 1 }
   0x6   : > { %s683_s19 = scalar_select %p39_p0, %s628_s13, %s41_s18  }
   0x7   : > { %p50_p4 = por %p49_p2, %p48_p1  ;;  %p685_p5 = por %p99_p3, %p48_p1 }
   0x8   : > { %p528_p6 = scmp.ge.s32.totalorder %s632_s14, 2 }
   0xa   : > { %127 = sbr.rel (%p528_p6) target bundleno = 24 (0x18), region = 24 }
   0xf   : > { %130 = sbr.rel (!%p50_p4) target bundleno = 24 (0x18), region = 28  ;;  %s132_s21 = sand.u32 (%p50_p4), 1, %s628_s13  }
  0x10   : > { %s553_s22 = sshll.u32 (%p50_p4), %s632_s14, 3  ;;  %s565_s23 = smul.u32 (%p50_p4), 72, %s132_s21 }
  0x11   : > { %s137_s26 = scalar_lea.vmem (%p50_p4), %s767_s1, %s553_s22 }
  0x12   : > { %v182_v0 = vld [vmem:[%s137_s26] sm:$0xff] (%p50_p4)  ;;  %v184_v1 = vld [vmem:[%s137_s26 + $0x10] sm:$0xff] (%p50_p4)  ;;  %s134_s27 = scalar_lea.vmem (%p50_p4), [#allocation2], %s565_s23 }
  0x13   : > { %v186_v2 = vld [vmem:[%s137_s26 + $0x20] sm:$0xff] (%p50_p4)  ;;  %v188_v3 = vld [vmem:[%s137_s26 + $0x30] sm:$0xff] (%p50_p4)  ;;  %183 = vst [vmem:[%s134_s27] sm:$0xff] (%p50_p4), %v182_v0  ;;  %185 = vst [vmem:[%s134_s27 + $0x8] sm:$0xff] (%p50_p4), %v184_v1 }
  0x14   : > { %v190_v4 = vld [vmem:[%s137_s26 + $0x40] sm:$0xff]  ;;  %v192_v5 = vld [vmem:[%s137_s26 + $0x50] sm:$0xff]  ;;  %187 = vst [vmem:[%s134_s27 + $0x10] sm:$0xff] %v186_v2  ;;  %189 = vst [vmem:[%s134_s27 + $0x18] sm:$0xff] %v188_v3 }
  0x15   : > { %191 = vst [vmem:[%s134_s27 + $0x20] sm:$0xff] %v190_v4  ;;  %193 = vst [vmem:[%s134_s27 + $0x28] sm:$0xff] %v192_v5  ;;  %v194_v6 = vld [vmem:[%s137_s26 + $0x60] sm:$0xff]  ;;  %v196_v7 = vld [vmem:[%s137_s26 + $0x70] sm:$0xff] }
  0x16   : > { %v198_v8 = vld [vmem:[%s137_s26 + $0x80] sm:$0xff]  ;;  %195 = vst [vmem:[%s134_s27 + $0x30] sm:$0xff] %v194_v6  ;;  %197 = vst [vmem:[%s134_s27 + $0x38] sm:$0xff] %v196_v7 }
  0x17   : > { %199 = vst [vmem:[%s134_s27 + $0x40] sm:$0xff] %v198_v8 }
  0x18 PF: > { %p531_p7 = scmp.ge.s32.totalorder %s632_s14, 1  ;;  %p204_p8 = scmp.lt.s32.totalorder %s632_s14, 3 }
  0x1a   : > { %p205_p9 = pnand %p531_p7, %p204_p8 }
  0x1b   : > { %s211_s28 = sand.u32 (!%p205_p9), 1, %s624_s12  }
  0x1c   : > { %208 = sbr.rel (%p205_p9) target bundleno = 269 (0x10d), region = 66  ;;  %s532_s23 = sshll.u32 (!%p205_p9), %s211_s28, 6 }
  0x1d   : > { %s566_s29 = smul.u32 (!%p205_p9), 72, %s211_s28  ;;  %s731_s24 = scalar_lea.vmem (!%p205_p9), [#allocation3], %s532_s23 }
  0x1f   : > { %s706_s7 = scalar_lea.vmem (!%p205_p9), [#allocation2], %s566_s29 }
  0x21   : > { %v634_v9 = vmov 0   ;;  %v249_v10 = vld [vmem:[%s768_s2] sm:$0xff]  ;;  %v251_v11 = vld [vmem:[%s768_s2 + $0x10] sm:$0xff]  ;;  %vm335_vm0 = vcmask 1043456   ;;  %v250_v16 = vld [vmem:[%s768_s2 + $0x8] sm:$0xff]  ;;  %vm328_vm1 = vcmask 588800  }
  0x22   : > { %374 = vmatprep.mubr.bf16.mxu0 %v634_v9  ;;  %384 = vmatprep.mubr.bf16.mxu1 %v634_v9  ;;  %v248_v12 = vld [vmem:[%s706_s7 + $0x40] sm:$0xff]  ;;  %v596_v15 = vld [vmem:[%s706_s7 + $0x34] ss:$8 sps:$4 sm:$0xff]   ;;  %v598_v19 = vld [vmem:[%s706_s7 + $0x30] ss:$8 sps:$4 sm:$0xff]   ;;  %s554_s12 = sshll.u32 (%p685_p5), %s525_s15, 4 }
  0x23   : > { %592 = vset.pattern.permute.xlu0 %v634_v9  ;;  %593 = vset.pattern.permute.xlu1 %v634_v9  ;;  %v544_v13 = vcombine.high %v248_v12, %v248_v12  ;;  %v543_v14 = vcombine.low %v248_v12, %v248_v12  ;;  %v252_v18 = vld [vmem:[%s768_s2 + $0x18] sm:$0xff]  ;;  %v599_v20 = vld [vmem:[%s706_s7 + $0x24] ss:$8 sps:$4 sm:$0xff]   ;;  %v601_v21 = vld [vmem:[%s706_s7 + $0x20] ss:$8 sps:$4 sm:$0xff]   ;;  %s437_s27 = scalar_lea.vmem (%p685_p5), %s769_s3, %s554_s12 }
  0x24   : > { %255 = vperm.xlu0 %592, %v249_v10   ;;  %265 = vperm.xlu1 %593, %v251_v11   ;;  %v602_v22 = vld [vmem:[%s706_s7 + $0x14] ss:$8 sps:$4 sm:$0xff]   ;;  %v604_v23 = vld [vmem:[%s706_s7 + $0x10] ss:$8 sps:$4 sm:$0xff]   ;;  %v605_v24 = vld [vmem:[%s706_s7 + $0x4] ss:$8 sps:$4 sm:$0xff]  }
  0x25   : > { %545 = vmatprep.subr.msk.bf16.mxu0 %vm335_vm0, %v544_v13  ;;  %555 = vmatprep.subr.msk.bf16.mxu1 %vm335_vm0, %v544_v13  ;;  %v337_v17 = vsel %vm335_vm0, %v543_v14, 0  ;;  %v607_v25 = vld [vmem:[%s706_s7] ss:$8 sps:$4 sm:$0xff]  }
  0x26   : > { %349 = vmatpush1.bf16.msra.mxu0 %v337_v17  ;;  %560 = vmatpush1.bf16.msra.mxu1 %v337_v17  ;;  %v608_v26 = vld [vmem:[%s766_s0] sm:$0xff]   ;;  %v609_v27 = vld [vmem:[%s766_s0 + $0x8] sm:$0xff]  }
  0x27   : > { %350 = vmatprep.subr.bf16.mxu0 %v596_v15  ;;  %556 = vmatprep.subr.bf16.mxu1 %v596_v15 }
  0x28   : > { %260 = vperm.xlu0 %592, %v250_v16   ;;  %270 = vperm.xlu1 %593, %v252_v18  }
  0x2a   : > { %351 = vmatpush1.bf16.msra.mxu0 %v598_v19  ;;  %561 = vmatpush1.bf16.msra.mxu1 %v598_v19 }
  0x2b   : > { %352 = vmatprep.subr.bf16.mxu0 %v599_v20  ;;  %557 = vmatprep.subr.bf16.mxu1 %v599_v20 }
  0x2e   : > { %353 = vmatpush1.bf16.msra.mxu0 %v601_v21  ;;  %562 = vmatpush1.bf16.msra.mxu1 %v601_v21 }
  0x2f   : > { %354 = vmatprep.subr.bf16.mxu0 %v602_v22  ;;  %558 = vmatprep.subr.bf16.mxu1 %v602_v22 }
  0x32   : > { %355 = vmatpush1.bf16.msra.mxu0 %v604_v23  ;;  %563 = vmatpush1.bf16.msra.mxu1 %v604_v23 }
  0x33   : > { %356 = vmatprep.subr.bf16.mxu0 %v605_v24  ;;  %559 = vmatprep.subr.bf16.mxu1 %v605_v24 }
  0x36   : > { %357 = vmatpush1.bf16.msra.mxu0 %v607_v25  ;;  %564 = vmatpush1.bf16.msra.mxu1 %v607_v25 }
  0x39   : > { %546 = vmatmul.mubr.msk.bf16.vlgmr.msra.gmra.mxu0 %vm328_vm1, %v608_v26  ;;  %547 = vmatmul.mubr.msk.bf16.vlgmr.msra.gmra.mxu1 %vm328_vm1, %v609_v27 }
  0x9f   : > { %v266_v28 = vpop.permute.xlu1 %265  ;;  %v256_v29 = vpop.permute.xlu0 %255 }
  0xa3   : > { %v271_v34 = vpop.permute.xlu1 %270  ;;  %v261_v38 = vpop.permute.xlu0 %260 }
  0xf9   : > { %v376_v30 = vpop.f32.mrf.mxu0  ;;  %v386_v31 = vpop.f32.mrf.mxu1 }
  0xfa   : > { %v377_v32 = vadd.f32 %v376_v30, %v256_v29  ;;  %v387_v33 = vadd.f32 %v386_v31, %v266_v28 }
  0xfb   : > { %v378_v35 = vpop.f32.mrf.mxu0  ;;  %v388_v36 = vpop.f32.mrf.mxu1 }
  0xfc   : > { %v404_v37 = vmax.f32 %v377_v32, 0.0  ;;  %424 = vst [vmem:[%s731_s24 + $0x20] sm:$0xff] %v387_v33  ;;  %v379_v39 = vadd.f32 %v378_v35, %v256_v29  ;;  %v389_v40 = vadd.f32 %v388_v36, %v266_v28 }
  0xfd   : > { %v380_v41 = vpop.f32.mrf.mxu0  ;;  %v390_v42 = vpop.f32.mrf.mxu1 }
  0xfe   : > { %420 = vst [vmem:[%s731_s24] sm:$0xff] %v404_v37  ;;  %v405_v43 = vmax.f32 %v379_v39, 0.0  ;;  %425 = vst [vmem:[%s731_s24 + $0x28] sm:$0xff] %v389_v40  ;;  %v381_v44 = vadd.f32 %v380_v41, %v261_v38  ;;  %v391_v45 = vadd.f32 %v390_v42, %v271_v34 }
  0xff   : > { %v382_v46 = vpop.f32.mrf.mxu0  ;;  %v392_v47 = vpop.f32.mrf.mxu1 }
 0x100   : > { %421 = vst [vmem:[%s731_s24 + $0x8] sm:$0xff] %v405_v43  ;;  %v406_v48 = vmax.f32 %v381_v44, 0.0  ;;  %426 = vst [vmem:[%s731_s24 + $0x30] sm:$0xff] %v391_v45  ;;  %v383_v49 = vadd.f32 %v382_v46, %v261_v38  ;;  %v393_v50 = vadd.f32 %v392_v47, %v271_v34  ;;  %434 = sbr.rel (!%p685_p5) target bundleno = 269 (0x10d), region = 74 }
 0x102   : > { %422 = vst [vmem:[%s731_s24 + $0x10] sm:$0xff] %v406_v48  ;;  %v407_v51 = vmax.f32 %v383_v49, 0.0  ;;  %427 = vst [vmem:[%s731_s24 + $0x38] sm:$0xff] %v393_v50 }
 0x103   : > { %v458_v56 = vld [vmem:[%s731_s24 + $0x20] sm:$0xff] (%p685_p5) }
 0x104   : > { %423 = vst [vmem:[%s731_s24 + $0x18] sm:$0xff] %v407_v51  ;;  %459 = vst [vmem:[%s437_s27 + $0x40] sm:$0xff] (%p685_p5), %v458_v56 }
 0x105   : > { %v450_v52 = vld [vmem:[%s731_s24] sm:$0xff]  ;;  %v460_v57 = vld [vmem:[%s731_s24 + $0x28] sm:$0xff] }
 0x106   : > { %451 = vst [vmem:[%s437_s27] sm:$0xff] %v450_v52  ;;  %461 = vst [vmem:[%s437_s27 + $0x48] sm:$0xff] %v460_v57 }
 0x107   : > { %v452_v53 = vld [vmem:[%s731_s24 + $0x8] sm:$0xff]  ;;  %v462_v58 = vld [vmem:[%s731_s24 + $0x30] sm:$0xff] }
 0x108   : > { %453 = vst [vmem:[%s437_s27 + $0x8] sm:$0xff] %v452_v53  ;;  %463 = vst [vmem:[%s437_s27 + $0x60] sm:$0xff] %v462_v58 }
 0x109   : > { %v454_v54 = vld [vmem:[%s731_s24 + $0x10] sm:$0xff]  ;;  %v464_v59 = vld [vmem:[%s731_s24 + $0x38] sm:$0xff] }
 0x10a   : > { %455 = vst [vmem:[%s437_s27 + $0x20] sm:$0xff] %v454_v54  ;;  %465 = vst [vmem:[%s437_s27 + $0x68] sm:$0xff] %v464_v59 }
 0x10b   : > { %v456_v55 = vld [vmem:[%s731_s24 + $0x18] sm:$0xff] }
 0x10c   : > { %457 = vst [vmem:[%s437_s27 + $0x28] sm:$0xff] %v456_v55 }
 0x10d PF: > { %p10_p10 = scmp.ge.s32.totalorder %s672_s16, 4   ;;  %s771_s12 = smov %s628_s13 }
 0x10e   : > { %s772_s13 = smov %s683_s19  ;;  %s773_s14 = smov %s672_s16 }
 0x10f   :  { %12 = sbr.rel (!%p10_p10) target bundleno = 2 (0x2), region = 128 }

// kernel: cnn_forward.8
= control target key start
LH: loop header
LB: loop body
LE: loop exit
PB: predicated region body
PF: predicated region fallthrough
CT: control target
= control target key end

     0   :  { %s796_s15 = smov 0   ;;  %s798_s16 = smov 0   ;;  %s925_s0 = inlined_call_operand.vmem [shape: bf16[16,144], index: 0, kind: input, shape index: {}]   ;;  %s926_s1 = inlined_call_operand.vmem [shape: bf16[144,512], index: 1, kind: input, shape index: {}]   ;;  %s927_s2 = inlined_call_operand.vmem [shape: f32[16,1], index: 2, kind: input, shape index: {}]   ;;  %s928_s3 = inlined_call_operand.vmem [shape: f32[16,512], index: 3, kind: input, shape index: {}]   ;;  %s929_s4 = inlined_call_operand.vmem [shape: f32[16,512], index: 4, kind: output, shape index: {}]  }
   0x1   :  { %s800_s17 = smov 0  }
   0x2 LB: > { %s647_s18 = sadd.s32 4294967295, %s768_s17   ;;  %s813_s19 = sadd.s32 1, %s768_s17   ;;  %s768_s17 = sphi %s800_s17, %s934_s17   ;;  %s764_s16 = sphi %s798_s16, %s933_s16   ;;  %s760_s15 = sphi %s796_s15, %s932_s15  }
   0x3   : > { %s39_s20 = ssub.s32 %s768_s17, %s813_s19  ;;  %s42_s21 = sadd.s32 1, %s764_s16 }
   0x4   : > { %p40_p0 = scmp.eq.s32.totalorder %s39_s20, 0  ;;  %p49_p1 = scmp.ne.s32.totalorder %s764_s16, %s760_s15 }
   0x5   : > { %p50_p2 = scmp.eq.s32.totalorder %s768_s17, 0  ;;  %p126_p3 = scmp.eq.s32.totalorder %s647_s18, 1 }
   0x6   : > { %s824_s22 = scalar_select %p40_p0, %s764_s16, %s42_s21  }
   0x7   : > { %p826_p4 = por %p50_p2, %p49_p1  ;;  %p830_p5 = por %p126_p3, %p49_p1 }
   0x8   : > { %p650_p6 = scmp.ge.s32.totalorder %s768_s17, 2 }
   0xa   : > { %154 = sbr.rel (%p650_p6) target bundleno = 34 (0x22), region = 24 }
   0xf   : > { %157 = sbr.rel (!%p826_p4) target bundleno = 28 (0x1c), region = 28  ;;  %s159_s25 = sand.u32 (%p826_p4), 1, %s764_s16  }
  0x10   : > { %s685_s26 = sshll.u32 (%p826_p4), %s768_s17, 3  ;;  %s688_s27 = smul.u32 (%p826_p4), 144, %s159_s25 }
  0x11   : > { %s842_s30 = scalar_lea.vmem (%p826_p4), %s926_s1, %s685_s26 }
  0x12   : > { %v227_v0 = vld [vmem:[%s842_s30] sm:$0xff] (%p826_p4)  ;;  %v229_v1 = vld [vmem:[%s842_s30 + $0x10] sm:$0xff] (%p826_p4)  ;;  %s161_s5 = scalar_lea.vmem (%p826_p4), [#allocation2], %s688_s27 }
  0x13   : > { %v231_v2 = vld [vmem:[%s842_s30 + $0x20] sm:$0xff] (%p826_p4)  ;;  %v233_v3 = vld [vmem:[%s842_s30 + $0x30] sm:$0xff] (%p826_p4)  ;;  %228 = vst [vmem:[%s161_s5] sm:$0xff] (%p826_p4), %v227_v0  ;;  %230 = vst [vmem:[%s161_s5 + $0x8] sm:$0xff] (%p826_p4), %v229_v1 }
  0x14   : > { %v235_v4 = vld [vmem:[%s842_s30 + $0x40] sm:$0xff]  ;;  %v237_v5 = vld [vmem:[%s842_s30 + $0x50] sm:$0xff]  ;;  %232 = vst [vmem:[%s161_s5 + $0x10] sm:$0xff] %v231_v2  ;;  %234 = vst [vmem:[%s161_s5 + $0x18] sm:$0xff] %v233_v3 }
  0x15   : > { %236 = vst [vmem:[%s161_s5 + $0x20] sm:$0xff] %v235_v4  ;;  %238 = vst [vmem:[%s161_s5 + $0x28] sm:$0xff] %v237_v5  ;;  %v239_v6 = vld [vmem:[%s842_s30 + $0x60] sm:$0xff]  ;;  %v241_v7 = vld [vmem:[%s842_s30 + $0x70] sm:$0xff] }
  0x16   : > { %v243_v8 = vld [vmem:[%s842_s30 + $0x80] sm:$0xff]  ;;  %240 = vst [vmem:[%s161_s5 + $0x30] sm:$0xff] %v239_v6  ;;  %242 = vst [vmem:[%s161_s5 + $0x38] sm:$0xff] %v241_v7  ;;  %v245_v9 = vld [vmem:[%s842_s30 + $0x90] sm:$0xff] }
  0x17   : > { %244 = vst [vmem:[%s161_s5 + $0x40] sm:$0xff] %v243_v8  ;;  %v247_v10 = vld [vmem:[%s842_s30 + $0xa0] sm:$0xff]  ;;  %v249_v11 = vld [vmem:[%s842_s30 + $0xb0] sm:$0xff]  ;;  %246 = vst [vmem:[%s161_s5 + $0x48] sm:$0xff] %v245_v9 }
  0x18   : > { %248 = vst [vmem:[%s161_s5 + $0x50] sm:$0xff] %v247_v10  ;;  %250 = vst [vmem:[%s161_s5 + $0x58] sm:$0xff] %v249_v11  ;;  %v251_v12 = vld [vmem:[%s842_s30 + $0xc0] sm:$0xff]  ;;  %v253_v13 = vld [vmem:[%s842_s30 + $0xd0] sm:$0xff] }
  0x19   : > { %v255_v14 = vld [vmem:[%s842_s30 + $0xe0] sm:$0xff]  ;;  %252 = vst [vmem:[%s161_s5 + $0x60] sm:$0xff] %v251_v12  ;;  %254 = vst [vmem:[%s161_s5 + $0x68] sm:$0xff] %v253_v13  ;;  %v257_v15 = vld [vmem:[%s842_s30 + $0xf0] sm:$0xff] }
  0x1a   : > { %256 = vst [vmem:[%s161_s5 + $0x70] sm:$0xff] %v255_v14  ;;  %v259_v16 = vld [vmem:[%s842_s30 + $0x100] sm:$0xff]  ;;  %v261_v17 = vld [vmem:[%s842_s30 + $0x110] sm:$0xff]  ;;  %258 = vst [vmem:[%s161_s5 + $0x78] sm:$0xff] %v257_v15 }
  0x1b   : > { %260 = vst [vmem:[%s161_s5 + $0x80] sm:$0xff] %v259_v16  ;;  %262 = vst [vmem:[%s161_s5 + $0x88] sm:$0xff] %v261_v17 }
  0x1c PF: > { %268 = sbr.rel (!%p826_p4) target bundleno = 34 (0x22), region = 66  ;;  %s270_s6 = sand.u32 (%p826_p4), 1, %s764_s16  }
  0x1d   : > { %s686_s7 = sshll.u32 (%p826_p4), %s768_s17, 4  ;;  %s653_s8 = sshll.u32 (%p826_p4), %s270_s6, 5 }
  0x1e   : > { %s275_s11 = scalar_lea.vmem (%p826_p4), %s928_s3, %s686_s7  ;;  %s272_s12 = scalar_lea.vmem (%p826_p4), [#allocation3], %s653_s8 }
  0x1f   : > { %v288_v18 = vld [vmem:[%s275_s11] sm:$0xff] (%p826_p4)  ;;  %v290_v19 = vld [vmem:[%s275_s11 + $0x8] sm:$0xff] (%p826_p4) }
  0x20   : > { %v292_v20 = vld [vmem:[%s275_s11 + $0x20] sm:$0xff] (%p826_p4)  ;;  %289 = vst [vmem:[%s272_s12] sm:$0xff] (%p826_p4), %v288_v18  ;;  %291 = vst [vmem:[%s272_s12 + $0x8] sm:$0xff] (%p826_p4), %v290_v19  ;;  %v294_v21 = vld [vmem:[%s275_s11 + $0x28] sm:$0xff] (%p826_p4) }
  0x21   : > { %293 = vst [vmem:[%s272_s12 + $0x10] sm:$0xff] %v292_v20  ;;  %295 = vst [vmem:[%s272_s12 + $0x18] sm:$0xff] %v294_v21 }
  0x22 PF: > { %p656_p7 = scmp.ge.s32.totalorder %s768_s17, 1  ;;  %p300_p8 = scmp.lt.s32.totalorder %s768_s17, 3 }
  0x24   : > { %p301_p9 = pnand %p656_p7, %p300_p8 }
  0x25   : > { %s307_s13 = sand.u32 (!%p301_p9), 1, %s760_s15  }
  0x26   : > { %304 = sbr.rel (%p301_p9) target bundleno = 296 (0x128), region = 89  ;;  %s657_s5 = sshll.u32 (!%p301_p9), %s307_s13, 5 }
  0x27   : > { %s689_s14 = smul.u32 (!%p301_p9), 144, %s307_s13  ;;  %s316_s6 = scalar_lea.vmem (!%p301_p9), [#allocation3], %s657_s5 }
  0x28   : > { %s341_s7 = scalar_lea.vmem (!%p301_p9), [#allocation4], %s657_s5 }
  0x29   : > { %s883_s28 = scalar_lea.vmem (!%p301_p9), [#allocation2], %s689_s14 }
  0x2b   : > { %vm477_vm0 = vcmask 130048   ;;  %v745_v22 = vld [vmem:[%s925_s0 + $0x4] ss:$8 sps:$4 sm:$0xff]   ;;  %v770_v24 = vmov 0   ;;  %v718_v27 = vld [vmem:[%s883_s28 + $0x70] ss:$8 sps:$4 sm:$0xff]  }
  0x2c   : > { %v366_v23 = vld [vmem:[%s927_s2] sm:$0xff]  ;;  %715 = vset.pattern.permute.xlu0 %v770_v24  ;;  %679 = vmatprep.mubr.msk.bf16.mxu0 %vm477_vm0, %v745_v22  ;;  %v367_v25 = vld [vmem:[%s927_s2 + $0x8] sm:$0xff]  ;;  %v526_v55 = vld [vmem:[%s316_s6 + $0x10] sm:$0xff]  ;;  %s687_s15 = sshll.u32 (%p830_p5), %s647_s18, 4 }
  0x2d   : > { %370 = vperm.xlu0 %715, %v366_v23   ;;  %v716_v26 = vld [vmem:[%s883_s28 + $0x74] ss:$8 sps:$4 sm:$0xff]   ;;  %v719_v28 = vld [vmem:[%s883_s28 + $0x64] ss:$8 sps:$4 sm:$0xff]   ;;  %v721_v29 = vld [vmem:[%s883_s28 + $0x60] ss:$8 sps:$4 sm:$0xff]   ;;  %s549_s10 = scalar_lea.vmem (%p830_p5), %s929_s4, %s687_s15 }
  0x2e   : > { %481 = vmatprep.subr.bf16.mxu0 %v716_v26  ;;  %v722_v30 = vld [vmem:[%s883_s28 + $0x54] ss:$8 sps:$4 sm:$0xff]   ;;  %v724_v31 = vld [vmem:[%s883_s28 + $0x50] ss:$8 sps:$4 sm:$0xff]   ;;  %v725_v32 = vld [vmem:[%s883_s28 + $0x44] ss:$8 sps:$4 sm:$0xff]  }
  0x2f   : > { %482 = vmatpush1.bf16.msra.mxu0 %v718_v27  ;;  %v727_v33 = vld [vmem:[%s883_s28 + $0x40] ss:$8 sps:$4 sm:$0xff]   ;;  %v728_v34 = vld [vmem:[%s883_s28 + $0x34] ss:$8 sps:$4 sm:$0xff]   ;;  %v730_v35 = vld [vmem:[%s883_s28 + $0x30] ss:$8 sps:$4 sm:$0xff]  }
  0x30   : > { %483 = vmatprep.subr.bf16.mxu0 %v719_v28  ;;  %v731_v36 = vld [vmem:[%s883_s28 + $0x24] ss:$8 sps:$4 sm:$0xff]   ;;  %v733_v37 = vld [vmem:[%s883_s28 + $0x20] ss:$8 sps:$4 sm:$0xff]   ;;  %v734_v38 = vld [vmem:[%s883_s28 + $0x14] ss:$8 sps:$4 sm:$0xff]  }
  0x31   : > { %375 = vperm.xlu0 %715, %v367_v25   ;;  %v736_v39 = vld [vmem:[%s883_s28 + $0x10] ss:$8 sps:$4 sm:$0xff]   ;;  %v737_v40 = vld [vmem:[%s883_s28 + $0x4] ss:$8 sps:$4 sm:$0xff]   ;;  %v739_v41 = vld [vmem:[%s883_s28] ss:$8 sps:$4 sm:$0xff]  }
  0x32   : > { %v740_v42 = vld [vmem:[%s883_s28 + $0x84] ss:$8 sps:$4 sm:$0xff]   ;;  %v742_v43 = vld [vmem:[%s883_s28 + $0x80] ss:$8 sps:$4 sm:$0xff]  }
  0x33   : > { %484 = vmatpush1.bf16.msra.mxu0 %v721_v29  ;;  %v743_v44 = vld [vmem:[%s925_s0] ss:$8 sps:$4 sm:$0xff]   ;;  %v527_v60 = vld [vmem:[%s316_s6 + $0x18] sm:$0xff] }
  0x34   : > { %485 = vmatprep.subr.bf16.mxu0 %v722_v30  ;;  %v524_v47 = vld [vmem:[%s316_s6] sm:$0xff]  ;;  %v525_v50 = vld [vmem:[%s316_s6 + $0x8] sm:$0xff] }
  0x37   : > { %486 = vmatpush1.bf16.msra.mxu0 %v724_v31 }
  0x38   : > { %487 = vmatprep.subr.bf16.mxu0 %v725_v32 }
  0x3b   : > { %488 = vmatpush1.bf16.msra.mxu0 %v727_v33 }
  0x3c   : > { %489 = vmatprep.subr.bf16.mxu0 %v728_v34 }
  0x3f   : > { %490 = vmatpush1.bf16.msra.mxu0 %v730_v35 }
  0x40   : > { %491 = vmatprep.subr.bf16.mxu0 %v731_v36 }
  0x43   : > { %492 = vmatpush1.bf16.msra.mxu0 %v733_v37 }
  0x44   : > { %493 = vmatprep.subr.bf16.mxu0 %v734_v38 }
  0x47   : > { %494 = vmatpush1.bf16.msra.mxu0 %v736_v39 }
  0x48   : > { %495 = vmatprep.subr.bf16.mxu0 %v737_v40 }
  0x4b   : > { %496 = vmatpush1.bf16.msra.mxu0 %v739_v41 }
  0x4c   : > { %511 = vmatprep.subr.bf16.mxu0 %v740_v42 }
  0x4f   : > { %512 = vmatpush2.bf16.msra.mxu0 %v742_v43 }
  0x52   : > { %514 = vmatmul.mubr.bf16.vlgmr.msra.gmra.mxu0 %v743_v44 }
  0xa8   : > { %v371_v45 = vpop.permute.xlu0 %370 }
  0xac   : > { %v376_v53 = vpop.permute.xlu0 %375 }
 0x112   : > { %v515_v46 = vpop.f32.mrf.mxu0 }
 0x113   : > { %v516_v48 = vadd.f32 %v515_v46, %v371_v45 }
 0x114   : > { %v517_v49 = vpop.f32.mrf.mxu0 }
 0x115   : > { %v528_v51 = vadd.f32 %v524_v47, %v516_v48  ;;  %v518_v52 = vadd.f32 %v517_v49, %v371_v45 }
 0x116   : > { %v519_v54 = vpop.f32.mrf.mxu0 }
 0x117   : > { %v532_v56 = vmax.f32 %v528_v51, 0.0  ;;  %v529_v57 = vadd.f32 %v525_v50, %v518_v52  ;;  %v520_v58 = vadd.f32 %v519_v54, %v376_v53 }
 0x118   : > { %v521_v59 = vpop.f32.mrf.mxu0 }
 0x119   : > { %536 = vst [vmem:[%s341_s7] sm:$0xff] %v532_v56  ;;  %v533_v61 = vmax.f32 %v529_v57, 0.0  ;;  %v530_v62 = vadd.f32 %v526_v55, %v520_v58  ;;  %v522_v63 = vadd.f32 %v521_v59, %v376_v53 }
 0x11b   : > { %537 = vst [vmem:[%s341_s7 + $0x8] sm:$0xff] %v533_v61  ;;  %v534_v0 = vmax.f32 %v530_v62, 0.0  ;;  %v531_v1 = vadd.f32 %v527_v60, %v522_v63  ;;  %546 = sbr.rel (!%p830_p5) target bundleno = 296 (0x128), region = 101 }
 0x11d   : > { %538 = vst [vmem:[%s341_s7 + $0x10] sm:$0xff] %v534_v0  ;;  %v535_v2 = vmax.f32 %v531_v1, 0.0 }
 0x11f   : > { %539 = vst [vmem:[%s341_s7 + $0x18] sm:$0xff] %v535_v2 }
 0x120   : > { %v562_v3 = vld [vmem:[%s341_s7] sm:$0xff] }
 0x121   : > { %563 = vst [vmem:[%s549_s10] sm:$0xff] %v562_v3 }
 0x122   : > { %v564_v4 = vld [vmem:[%s341_s7 + $0x8] sm:$0xff] }
 0x123   : > { %565 = vst [vmem:[%s549_s10 + $0x8] sm:$0xff] %v564_v4 }
 0x124   : > { %v566_v5 = vld [vmem:[%s341_s7 + $0x10] sm:$0xff] }
 0x125   : > { %567 = vst [vmem:[%s549_s10 + $0x20] sm:$0xff] %v566_v5 }
 0x126   : > { %v568_v6 = vld [vmem:[%s341_s7 + $0x18] sm:$0xff] }
 0x127   : > { %569 = vst [vmem:[%s549_s10 + $0x28] sm:$0xff] %v568_v6 }
 0x128 PF: > { %p11_p10 = scmp.ge.s32.totalorder %s813_s19, 4   ;;  %s932_s15 = smov %s764_s16 }
 0x129   : > { %s933_s16 = smov %s824_s22  ;;  %s934_s17 = smov %s813_s19 }
 0x12a   :  { %13 = sbr.rel (!%p11_p10) target bundleno = 2 (0x2), region = 163 }

// kernel: cnn_forward.9
= control target key start
LH: loop header
LB: loop body
LE: loop exit
PB: predicated region body
PF: predicated region fallthrough
CT: control target
= control target key end

     0   :  { %v553_v28 = vlaneseq  ;;  %v4023_v36 = vmov 1966171168   ;;  %s4916_s0 = inlined_call_operand.vmem [shape: bf16[2,4096], index: 0, kind: input, shape index: {}]   ;;  %s4917_s1 = inlined_call_operand.vmem [shape: bf16[4096,128], index: 1, kind: input, shape index: {}]   ;;  %s4918_s2 = inlined_call_operand.vmem [shape: f32[1,128], index: 2, kind: input, shape index: {}]   ;;  %s4919_s3 = inlined_call_operand.vmem [shape: bf16[128,14], index: 3, kind: input, shape index: {}]   ;;  %s4920_s4 = inlined_call_operand.vmem [shape: f32[1,14], index: 4, kind: input, shape index: {}]   ;;  %s4921_s5 = inlined_call_operand.hbm [shape: f32[2,14], index: 5, kind: output, shape index: {}]  }
   0x1   :  { %v3733_v0 = vld [vmem:[%s4917_s1 + $0x78] sm:$0xff]   ;;  %v3737_v4 = vld [vmem:[%s4917_s1 + $0x70] sm:$0xff]   ;;  %v3741_v8 = vld [vmem:[%s4917_s1 + $0x68] sm:$0xff]   ;;  %v551_v37 = vunpack.c.l.s4 %v4023_v36 }
   0x2   :  { %v3734_v1 = vld [vmem:[%s4917_s1 + $0xf8] sm:$0xff]   ;;  %3348 = vmatprep.subr.bf16.mxu0 %v3733_v0  ;;  %v3738_v5 = vld [vmem:[%s4917_s1 + $0xf0] sm:$0xff]   ;;  %v3742_v9 = vld [vmem:[%s4917_s1 + $0xe8] sm:$0xff]   ;;  %v554_v33 = vshrl.u32 %v553_v28, 7 }
   0x3   :  { %v3735_v2 = vld [vmem:[%s4917_s1 + $0x38] sm:$0xff]   ;;  %3370 = vmatprep.subr.bf16.mxu1 %v3734_v1  ;;  %v3739_v6 = vld [vmem:[%s4917_s1 + $0x30] sm:$0xff]   ;;  %v3743_v10 = vld [vmem:[%s4917_s1 + $0x28] sm:$0xff]   ;;  %v552_v40 = vunpack.c.0.s8 %v551_v37 }
   0x4   :  { %v3736_v3 = vld [vmem:[%s4917_s1 + $0xb8] sm:$0xff]   ;;  %3349 = vmatpush3.bf16.msra.mxu0 %v3735_v2  ;;  %v3740_v7 = vld [vmem:[%s4917_s1 + $0xb0] sm:$0xff]   ;;  %v3744_v11 = vld [vmem:[%s4917_s1 + $0xa8] sm:$0xff]  }
   0x5   :  { %3371 = vmatpush3.bf16.msra.mxu1 %v3736_v3  ;;  %3350 = vmatprep.subr.bf16.mxu0 %v3737_v4  ;;  %v3745_v12 = vld [vmem:[%s4917_s1 + $0x60] sm:$0xff]   ;;  %v3749_v16 = vld [vmem:[%s4917_s1 + $0x58] sm:$0xff]   ;;  %v3753_v20 = vld [vmem:[%s4917_s1 + $0x50] sm:$0xff]   ;;  %v4162_v41 = vsub.s32 %v552_v40, %v554_v33 }
   0x6   :  { %3372 = vmatprep.subr.bf16.mxu1 %v3738_v5  ;;  %v3746_v13 = vld [vmem:[%s4917_s1 + $0xe0] sm:$0xff]   ;;  %v3750_v17 = vld [vmem:[%s4917_s1 + $0xd8] sm:$0xff]   ;;  %v3754_v21 = vld [vmem:[%s4917_s1 + $0xd0] sm:$0xff]  }
   0x7   :  { %v3747_v14 = vld [vmem:[%s4917_s1 + $0x20] sm:$0xff]   ;;  %v3751_v18 = vld [vmem:[%s4917_s1 + $0x18] sm:$0xff]   ;;  %v3755_v22 = vld [vmem:[%s4917_s1 + $0x10] sm:$0xff]  }
   0x8   :  { %3351 = vmatpush3.bf16.msra.mxu0 %v3739_v6  ;;  %v3748_v15 = vld [vmem:[%s4917_s1 + $0xa0] sm:$0xff]   ;;  %v3752_v19 = vld [vmem:[%s4917_s1 + $0x98] sm:$0xff]   ;;  %v3756_v23 = vld [vmem:[%s4917_s1 + $0x90] sm:$0xff]  }
   0x9   :  { %3373 = vmatpush3.bf16.msra.mxu1 %v3740_v7  ;;  %3352 = vmatprep.subr.bf16.mxu0 %v3741_v8  ;;  %v3757_v24 = vld [vmem:[%s4917_s1 + $0x48] sm:$0xff]   ;;  %v3761_v29 = vld [vmem:[%s4917_s1 + $0x40] sm:$0xff]   ;;  %v3766_v35 = vld [vmem:[%s4917_s1 + $0x178] sm:$0xff]  }
   0xa   :  { %3374 = vmatprep.subr.bf16.mxu1 %v3742_v9  ;;  %v3758_v25 = vld [vmem:[%s4917_s1 + $0xc8] sm:$0xff]   ;;  %v3762_v30 = vld [vmem:[%s4917_s1 + $0xc0] sm:$0xff]   ;;  %v3767_v38 = vld [vmem:[%s4917_s1 + $0x1f8] sm:$0xff]  }
   0xb   :  { %v3759_v26 = vld [vmem:[%s4917_s1 + $0x8] sm:$0xff]   ;;  %v3763_v31 = vld [vmem:[%s4917_s1] sm:$0xff]   ;;  %v3768_v47 = vld [vmem:[%s4917_s1 + $0x138] sm:$0xff]  }
   0xc   :  { %3353 = vmatpush3.bf16.msra.mxu0 %v3743_v10  ;;  %v3760_v27 = vld [vmem:[%s4917_s1 + $0x88] sm:$0xff]   ;;  %v3764_v32 = vld [vmem:[%s4917_s1 + $0x80] sm:$0xff]   ;;  %v3769_v49 = vld [vmem:[%s4917_s1 + $0x1b8] sm:$0xff]  }
   0xd   :  { %3375 = vmatpush3.bf16.msra.mxu1 %v3744_v11  ;;  %3354 = vmatprep.subr.bf16.mxu0 %v3745_v12  ;;  %v22_v34 = vld [vmem:[%s4916_s0] sm:$0xff]  ;;  %v3770_v52 = vld [vmem:[%s4917_s1 + $0x170] sm:$0xff]   ;;  %v3774_v58 = vld [vmem:[%s4917_s1 + $0x168] sm:$0xff]  }
   0xe   :  { %3376 = vmatprep.subr.bf16.mxu1 %v3746_v13  ;;  %v549_v39 = vcombine.high %v22_v34, %v22_v34  ;;  %v556_v42 = vrot.slane %v22_v34, %v4162_v41  ;;  %v3771_v54 = vld [vmem:[%s4917_s1 + $0x1f0] sm:$0xff]   ;;  %v3775_v59 = vld [vmem:[%s4917_s1 + $0x1e8] sm:$0xff]   ;;  %v3778_v62 = vld [vmem:[%s4917_s1 + $0x160] sm:$0xff]  }
   0xf   :  { %v3772_v55 = vld [vmem:[%s4917_s1 + $0x130] sm:$0xff]   ;;  %v3776_v60 = vld [vmem:[%s4917_s1 + $0x128] sm:$0xff]   ;;  %v3779_v63 = vld [vmem:[%s4917_s1 + $0x1e0] sm:$0xff]  }
  0x10   :  { %3355 = vmatpush3.bf16.msra.mxu0 %v3747_v14  ;;  %v4166_v43 = vrot.slane %v549_v39, %v4162_v41  ;;  %v564_v44 = vcombine.high %v556_v42, %v556_v42  ;;  %v572_v45 = vrot.slane %v556_v42, %v4162_v41  ;;  %v3773_v57 = vld [vmem:[%s4917_s1 + $0x1b0] sm:$0xff]   ;;  %v3777_v61 = vld [vmem:[%s4917_s1 + $0x1a8] sm:$0xff]   ;;  %v3780_v0 = vld [vmem:[%s4917_s1 + $0x120] sm:$0xff]  }
  0x11   :  { %3377 = vmatpush3.bf16.msra.mxu1 %v3748_v15  ;;  %3356 = vmatprep.subr.bf16.mxu0 %v3749_v16  ;;  %v3781_v1 = vld [vmem:[%s4917_s1 + $0x1a0] sm:$0xff]   ;;  %v3782_v2 = vld [vmem:[%s4917_s1 + $0x158] sm:$0xff]   ;;  %v3786_v6 = vld [vmem:[%s4917_s1 + $0x150] sm:$0xff]  }
  0x12   :  { %3378 = vmatprep.subr.bf16.mxu1 %v3750_v17  ;;  %v565_v46 = vcombine.high %v4166_v43, %v4166_v43  ;;  %v586_v48 = vrot.slane %v564_v44, %v4162_v41  ;;  %v594_v51 = vcombine.high %v572_v45, %v572_v45  ;;  %v3783_v3 = vld [vmem:[%s4917_s1 + $0x1d8] sm:$0xff]   ;;  %v3787_v7 = vld [vmem:[%s4917_s1 + $0x1d0] sm:$0xff]   ;;  %v3790_v10 = vld [vmem:[%s4917_s1 + $0x148] sm:$0xff]  }
  0x13   :  { %v3784_v4 = vld [vmem:[%s4917_s1 + $0x118] sm:$0xff]   ;;  %v3788_v8 = vld [vmem:[%s4917_s1 + $0x110] sm:$0xff]   ;;  %v3791_v11 = vld [vmem:[%s4917_s1 + $0x1c8] sm:$0xff]  }
  0x14   :  { %3357 = vmatpush3.bf16.msra.mxu0 %v3751_v18  ;;  %v593_v50 = vrot.slane %v565_v46, %v4162_v41  ;;  %2345 = vmatprep.mubr.bf16.mxu0 %v586_v48  ;;  %v596_v53 = vcombine.high %v586_v48, %v586_v48  ;;  %v3785_v5 = vld [vmem:[%s4917_s1 + $0x198] sm:$0xff]   ;;  %v3789_v9 = vld [vmem:[%s4917_s1 + $0x190] sm:$0xff]   ;;  %v3792_v12 = vld [vmem:[%s4917_s1 + $0x108] sm:$0xff]   ;;  %v579_v18 = vrot.slane %v4166_v43, %v4162_v41 }
  0x15   :  { %3379 = vmatpush3.bf16.msra.mxu1 %v3752_v19  ;;  %3358 = vmatprep.subr.bf16.mxu0 %v3753_v20  ;;  %v3793_v13 = vld [vmem:[%s4917_s1 + $0x188] sm:$0xff]   ;;  %v3794_v14 = vld [vmem:[%s4917_s1 + $0x140] sm:$0xff]   ;;  %v3798_v19 = vld [vmem:[%s4917_s1 + $0x278] sm:$0xff]  }
  0x16   :  { %3380 = vmatprep.subr.bf16.mxu1 %v3754_v21  ;;  %v597_v56 = vcombine.high %v593_v50, %v593_v50  ;;  %2385 = vmatprep.mubr.bf16.mxu1 %v596_v53  ;;  %v3795_v15 = vld [vmem:[%s4917_s1 + $0x1c0] sm:$0xff]   ;;  %v3799_v20 = vld [vmem:[%s4917_s1 + $0x2f8] sm:$0xff]   ;;  %v3806_v28 = vld [vmem:[%s4917_s1 + $0x268] sm:$0xff]  }
  0x17   :  { %v3796_v16 = vld [vmem:[%s4917_s1 + $0x100] sm:$0xff]   ;;  %v3800_v21 = vld [vmem:[%s4917_s1 + $0x238] sm:$0xff]   ;;  %v3818_v40 = vld [vmem:[%s4917_s1 + $0x250] sm:$0xff]  }
  0x18   :  { %3359 = vmatpush3.bf16.msra.mxu0 %v3755_v22  ;;  %v3797_v17 = vld [vmem:[%s4917_s1 + $0x180] sm:$0xff]   ;;  %v3801_v22 = vld [vmem:[%s4917_s1 + $0x2b8] sm:$0xff]   ;;  %v3819_v42 = vld [vmem:[%s4917_s1 + $0x2d0] sm:$0xff]  }
  0x19   :  { %3381 = vmatpush3.bf16.msra.mxu1 %v3756_v23  ;;  %3360 = vmatprep.subr.bf16.mxu0 %v3757_v24  ;;  %v595_v23 = vcombine.high %v579_v18, %v579_v18  ;;  %v3802_v24 = vld [vmem:[%s4917_s1 + $0x270] sm:$0xff]   ;;  %v3811_v33 = vld [vmem:[%s4917_s1 + $0x2e0] sm:$0xff]   ;;  %v3814_v36 = vld [vmem:[%s4917_s1 + $0x258] sm:$0xff]  }
  0x1a   :  { %3382 = vmatprep.subr.bf16.mxu1 %v3758_v25  ;;  %v3803_v25 = vld [vmem:[%s4917_s1 + $0x2f0] sm:$0xff]   ;;  %v3812_v34 = vld [vmem:[%s4917_s1 + $0x220] sm:$0xff]   ;;  %v3815_v37 = vld [vmem:[%s4917_s1 + $0x2d8] sm:$0xff]  }
  0x1b   :  { %v3817_v39 = vld [vmem:[%s4917_s1 + $0x298] sm:$0xff]   ;;  %v3820_v43 = vld [vmem:[%s4917_s1 + $0x210] sm:$0xff]   ;;  %v23_v46 = vld [vmem:[%s4916_s0 + $0x8] sm:$0xff] }
  0x1c   :  { %3361 = vmatpush3.bf16.msra.mxu0 %v3759_v26  ;;  %v3804_v26 = vld [vmem:[%s4917_s1 + $0x230] sm:$0xff]   ;;  %v605_v48 = vrot.slane %v23_v46, %v4162_v41 }
  0x1d   :  { %3383 = vmatpush3.bf16.msra.mxu1 %v3760_v27  ;;  %3362 = vmatprep.subr.bf16.mxu0 %v3761_v29  ;;  %v3805_v27 = vld [vmem:[%s4917_s1 + $0x2b0] sm:$0xff]   ;;  %v3807_v29 = vld [vmem:[%s4917_s1 + $0x2e8] sm:$0xff]  }
  0x1e   :  { %3384 = vmatprep.subr.bf16.mxu1 %v3762_v30  ;;  %v3808_v30 = vld [vmem:[%s4917_s1 + $0x228] sm:$0xff]   ;;  %v3821_v44 = vld [vmem:[%s4917_s1 + $0x290] sm:$0xff]  }
  0x20   :  { %3363 = vmatpush3.bf16.msra.mxu0 %v3763_v31  ;;  %v3809_v31 = vld [vmem:[%s4917_s1 + $0x2a8] sm:$0xff]  }
  0x21   :  { %3385 = vmatpush3.bf16.msra.mxu1 %v3764_v32  ;;  %3392 = vmatprep.subr.bf16.mxu0 %v3766_v35  ;;  %v3810_v32 = vld [vmem:[%s4917_s1 + $0x260] sm:$0xff]  }
  0x22   :  { %3414 = vmatprep.subr.bf16.mxu1 %v3767_v38  ;;  %v3813_v35 = vld [vmem:[%s4917_s1 + $0x2a0] sm:$0xff]   ;;  %v3816_v38 = vld [vmem:[%s4917_s1 + $0x218] sm:$0xff]  }
  0x23   :  { %2346 = vmatmul.mubr.bf16.vlgmr.msra.gmra.mxu0 %v572_v45  ;;  %v3822_v45 = vld [vmem:[%s4917_s1 + $0x248] sm:$0xff]  }
  0x24   :  { %3393 = vmatpush3.bf16.msra.mxu0 %v3768_v47  ;;  %2386 = vmatmul.mubr.bf16.vlgmr.msra.gmra.mxu1 %v594_v51  ;;  %v3823_v47 = vld [vmem:[%s4917_s1 + $0x2c8] sm:$0xff]  }
  0x25   :  { %3394 = vmatprep.subr.bf16.mxu0 %v3770_v52  ;;  %3415 = vmatpush3.bf16.msra.mxu1 %v3769_v49  ;;  %v598_v49 = vcombine.high %v23_v46, %v23_v46  ;;  %v3825_v51 = vld [vmem:[%s4917_s1 + $0x288] sm:$0xff]   ;;  %v613_v52 = vcombine.high %v605_v48, %v605_v48 }
  0x26   :  { %2425 = vmatprep.mubr.bf16.mxu0 %v593_v50  ;;  %3416 = vmatprep.subr.bf16.mxu1 %v3771_v54  ;;  %v3824_v50 = vld [vmem:[%s4917_s1 + $0x208] sm:$0xff]   ;;  %v3826_v54 = vld [vmem:[%s4917_s1 + $0x240] sm:$0xff]  }
  0x27   :  { %2465 = vmatprep.mubr.bf16.mxu1 %v597_v56  ;;  %v4354_v53 = vrot.slane %v598_v49, %v4162_v41  ;;  %v635_v56 = vrot.slane %v613_v52, %v4162_v41  ;;  %v3873_v46 = vld [vmem:[%s4917_s1 + $0x428] sm:$0xff]   ;;  %v3876_v49 = vld [vmem:[%s4917_s1 + $0x4e0] sm:$0xff]   ;;  %v3879_v52 = vld [vmem:[%s4917_s1 + $0x458] sm:$0xff]  }
  0x28   :  { %3395 = vmatpush3.bf16.msra.mxu0 %v3772_v55  ;;  %v3827_v55 = vld [vmem:[%s4917_s1 + $0x2c0] sm:$0xff]  }
  0x29   :  { %3396 = vmatprep.subr.bf16.mxu0 %v3774_v58  ;;  %3417 = vmatpush3.bf16.msra.mxu1 %v3773_v57  ;;  %v614_v57 = vcombine.high %v4354_v53, %v4354_v53  ;;  %v3828_v58 = vld [vmem:[%s4917_s1 + $0x200] sm:$0xff]  }
  0x2a   :  { %3418 = vmatprep.subr.bf16.mxu1 %v3775_v59  ;;  %v3829_v59 = vld [vmem:[%s4917_s1 + $0x280] sm:$0xff]  }
  0x2c   :  { %3397 = vmatpush3.bf16.msra.mxu0 %v3776_v60  ;;  %v645_v60 = vcombine.high %v635_v56, %v635_v56 }
  0x2d   :  { %3398 = vmatprep.subr.bf16.mxu0 %v3778_v62  ;;  %3419 = vmatpush3.bf16.msra.mxu1 %v3777_v61  ;;  %v621_v61 = vrot.slane %v605_v48, %v4162_v41  ;;  %v3830_v62 = vld [vmem:[%s4917_s1 + $0x378] sm:$0xff]   ;;  %v3875_v48 = vld [vmem:[%s4917_s1 + $0x460] sm:$0xff]  }
  0x2e   :  { %3420 = vmatprep.subr.bf16.mxu1 %v3779_v63  ;;  %v3831_v63 = vld [vmem:[%s4917_s1 + $0x3f8] sm:$0xff]  }
  0x30   :  { %3399 = vmatpush3.bf16.msra.mxu0 %v3780_v0  ;;  %v642_v0 = vrot.slane %v614_v57, %v4162_v41  ;;  %v3884_v57 = vld [vmem:[%s4917_s1 + $0x4d0] sm:$0xff]  }
  0x31   :  { %3400 = vmatprep.subr.bf16.mxu0 %v3782_v2  ;;  %3421 = vmatpush3.bf16.msra.mxu1 %v3781_v1  ;;  %v3832_v1 = vld [vmem:[%s4917_s1 + $0x338] sm:$0xff]  }
  0x32   :  { %3422 = vmatprep.subr.bf16.mxu1 %v3783_v3  ;;  %v3833_v2 = vld [vmem:[%s4917_s1 + $0x3b8] sm:$0xff]   ;;  %v643_v3 = vcombine.high %v621_v61, %v621_v61 }
  0x34   :  { %3401 = vmatpush3.bf16.msra.mxu0 %v3784_v4  ;;  %v3834_v4 = vld [vmem:[%s4917_s1 + $0x370] sm:$0xff]  }
  0x35   :  { %3402 = vmatprep.subr.bf16.mxu0 %v3786_v6  ;;  %3423 = vmatpush3.bf16.msra.mxu1 %v3785_v5  ;;  %v3835_v5 = vld [vmem:[%s4917_s1 + $0x3f0] sm:$0xff]   ;;  %v646_v6 = vcombine.high %v642_v0, %v642_v0 }
  0x36   :  { %3424 = vmatprep.subr.bf16.mxu1 %v3787_v7  ;;  %v3836_v7 = vld [vmem:[%s4917_s1 + $0x330] sm:$0xff]  }
  0x38   :  { %3403 = vmatpush3.bf16.msra.mxu0 %v3788_v8  ;;  %v3837_v8 = vld [vmem:[%s4917_s1 + $0x3b0] sm:$0xff]  }
  0x39   :  { %3404 = vmatprep.subr.bf16.mxu0 %v3790_v10  ;;  %3425 = vmatpush3.bf16.msra.mxu1 %v3789_v9  ;;  %v3838_v9 = vld [vmem:[%s4917_s1 + $0x368] sm:$0xff]  }
  0x3a   :  { %3426 = vmatprep.subr.bf16.mxu1 %v3791_v11  ;;  %v3839_v10 = vld [vmem:[%s4917_s1 + $0x3e8] sm:$0xff]  }
  0x3b   :  { %v3840_v11 = vld [vmem:[%s4917_s1 + $0x328] sm:$0xff]  }
  0x3c   :  { %3405 = vmatpush3.bf16.msra.mxu0 %v3792_v12  ;;  %v3841_v12 = vld [vmem:[%s4917_s1 + $0x3a8] sm:$0xff]  }
  0x3d   :  { %3406 = vmatprep.subr.bf16.mxu0 %v3794_v14  ;;  %3427 = vmatpush3.bf16.msra.mxu1 %v3793_v13  ;;  %v3842_v13 = vld [vmem:[%s4917_s1 + $0x360] sm:$0xff]  }
  0x3e   :  { %3428 = vmatprep.subr.bf16.mxu1 %v3795_v15  ;;  %v3843_v14 = vld [vmem:[%s4917_s1 + $0x3e0] sm:$0xff]  }
  0x3f   :  { %v3844_v15 = vld [vmem:[%s4917_s1 + $0x320] sm:$0xff]  }
  0x40   :  { %3407 = vmatpush3.bf16.msra.mxu0 %v3796_v16  ;;  %v3845_v16 = vld [vmem:[%s4917_s1 + $0x3a0] sm:$0xff]  }
  0x41   :  { %3436 = vmatprep.subr.bf16.mxu0 %v3798_v19  ;;  %3429 = vmatpush3.bf16.msra.mxu1 %v3797_v17  ;;  %v3846_v17 = vld [vmem:[%s4917_s1 + $0x358] sm:$0xff]  }
  0x42   :  { %3458 = vmatprep.subr.bf16.mxu1 %v3799_v20  ;;  %v3848_v19 = vld [vmem:[%s4917_s1 + $0x318] sm:$0xff]  }
  0x43   :  { %2426 = vmatmul.mubr.bf16.vlgmr.msra.gmra.mxu0 %v579_v18  ;;  %v3847_v18 = vld [vmem:[%s4917_s1 + $0x3d8] sm:$0xff]  }
  0x44   :  { %3437 = vmatpush3.bf16.msra.mxu0 %v3800_v21  ;;  %2466 = vmatmul.mubr.bf16.vlgmr.msra.gmra.mxu1 %v595_v23  ;;  %v3849_v20 = vld [vmem:[%s4917_s1 + $0x398] sm:$0xff]   ;;  %v3850_v21 = vld [vmem:[%s4917_s1 + $0x350] sm:$0xff]  }
  0x45   :  { %3438 = vmatprep.subr.bf16.mxu0 %v3802_v24  ;;  %3459 = vmatpush3.bf16.msra.mxu1 %v3801_v22  ;;  %v3851_v22 = vld [vmem:[%s4917_s1 + $0x3d0] sm:$0xff]  }
  0x46   :  { %3460 = vmatprep.subr.bf16.mxu1 %v3803_v25  ;;  %2505 = vmatprep.mubr.bf16.mxu0 %v635_v56  ;;  %v3852_v23 = vld [vmem:[%s4917_s1 + $0x310] sm:$0xff]   ;;  %v3854_v25 = vld [vmem:[%s4917_s1 + $0x348] sm:$0xff]  }
  0x47   :  { %2545 = vmatprep.mubr.bf16.mxu1 %v645_v60  ;;  %v3853_v24 = vld [vmem:[%s4917_s1 + $0x390] sm:$0xff]   ;;  %v3887_v60 = vld [vmem:[%s4917_s1 + $0x448] sm:$0xff]  }
  0x48   :  { %3439 = vmatpush3.bf16.msra.mxu0 %v3804_v26  ;;  %v3855_v26 = vld [vmem:[%s4917_s1 + $0x3c8] sm:$0xff]   ;;  %v3883_v56 = vld [vmem:[%s4917_s1 + $0x450] sm:$0xff]  }
  0x49   :  { %3440 = vmatprep.subr.bf16.mxu0 %v3806_v28  ;;  %3461 = vmatpush3.bf16.msra.mxu1 %v3805_v27  ;;  %v3856_v27 = vld [vmem:[%s4917_s1 + $0x308] sm:$0xff]  }
  0x4a   :  { %3462 = vmatprep.subr.bf16.mxu1 %v3807_v29  ;;  %v3857_v28 = vld [vmem:[%s4917_s1 + $0x388] sm:$0xff]   ;;  %v3858_v29 = vld [vmem:[%s4917_s1 + $0x340] sm:$0xff]  }
  0x4c   :  { %3441 = vmatpush3.bf16.msra.mxu0 %v3808_v30  ;;  %v3859_v30 = vld [vmem:[%s4917_s1 + $0x3c0] sm:$0xff]  }
  0x4d   :  { %3442 = vmatprep.subr.bf16.mxu0 %v3810_v32  ;;  %3463 = vmatpush3.bf16.msra.mxu1 %v3809_v31  ;;  %v3860_v31 = vld [vmem:[%s4917_s1 + $0x300] sm:$0xff]  }
  0x4e   :  { %3464 = vmatprep.subr.bf16.mxu1 %v3811_v33  ;;  %v3861_v32 = vld [vmem:[%s4917_s1 + $0x380] sm:$0xff]   ;;  %v628_v33 = vrot.slane %v4354_v53, %v4162_v41  ;;  %v3880_v53 = vld [vmem:[%s4917_s1 + $0x4d8] sm:$0xff]  }
  0x50   :  { %3443 = vmatpush3.bf16.msra.mxu0 %v3812_v34  ;;  %v3863_v34 = vld [vmem:[%s4917_s1 + $0x478] sm:$0xff]  }
  0x51   :  { %3444 = vmatprep.subr.bf16.mxu0 %v3814_v36  ;;  %3465 = vmatpush3.bf16.msra.mxu1 %v3813_v35  ;;  %v3864_v35 = vld [vmem:[%s4917_s1 + $0x4f8] sm:$0xff]  }
  0x52   :  { %3466 = vmatprep.subr.bf16.mxu1 %v3815_v37  ;;  %v3865_v36 = vld [vmem:[%s4917_s1 + $0x438] sm:$0xff]  }
  0x53   :  { %v3866_v37 = vld [vmem:[%s4917_s1 + $0x4b8] sm:$0xff]  }
  0x54   :  { %3445 = vmatpush3.bf16.msra.mxu0 %v3816_v38  ;;  %v644_v38 = vcombine.high %v628_v33, %v628_v33 }
  0x55   :  { %3446 = vmatprep.subr.bf16.mxu0 %v3818_v40  ;;  %3467 = vmatpush3.bf16.msra.mxu1 %v3817_v39  ;;  %v3867_v39 = vld [vmem:[%s4917_s1 + $0x470] sm:$0xff]  }
  0x56   :  { %3468 = vmatprep.subr.bf16.mxu1 %v3819_v42  ;;  %v3868_v40 = vld [vmem:[%s4917_s1 + $0x4f0] sm:$0xff]  }
  0x57   :  { %v3869_v42 = vld [vmem:[%s4917_s1 + $0x430] sm:$0xff]  }
  0x58   :  { %3447 = vmatpush3.bf16.msra.mxu0 %v3820_v43  ;;  %v3870_v43 = vld [vmem:[%s4917_s1 + $0x4b0] sm:$0xff]  }
  0x59   :  { %3448 = vmatprep.subr.bf16.mxu0 %v3822_v45  ;;  %3469 = vmatpush3.bf16.msra.mxu1 %v3821_v44  ;;  %v3871_v44 = vld [vmem:[%s4917_s1 + $0x468] sm:$0xff]  }
  0x5a   :  { %3470 = vmatprep.subr.bf16.mxu1 %v3823_v47  ;;  %v3872_v45 = vld [vmem:[%s4917_s1 + $0x4e8] sm:$0xff]  }
  0x5b   :  { %v3874_v47 = vld [vmem:[%s4917_s1 + $0x4a8] sm:$0xff]  }
  0x5c   :  { %3449 = vmatpush3.bf16.msra.mxu0 %v3824_v50  ;;  %v3877_v50 = vld [vmem:[%s4917_s1 + $0x420] sm:$0xff]  }
  0x5d   :  { %3450 = vmatprep.subr.bf16.mxu0 %v3826_v54  ;;  %3471 = vmatpush3.bf16.msra.mxu1 %v3825_v51  ;;  %v3878_v51 = vld [vmem:[%s4917_s1 + $0x4a0] sm:$0xff]   ;;  %v3881_v54 = vld [vmem:[%s4917_s1 + $0x418] sm:$0xff]  }
  0x5e   :  { %3472 = vmatprep.subr.bf16.mxu1 %v3827_v55  ;;  %v3882_v55 = vld [vmem:[%s4917_s1 + $0x498] sm:$0xff]  }
  0x60   :  { %3451 = vmatpush3.bf16.msra.mxu0 %v3828_v58  ;;  %v3885_v58 = vld [vmem:[%s4917_s1 + $0x410] sm:$0xff]  }
  0x61   :  { %3480 = vmatprep.subr.bf16.mxu0 %v3830_v62  ;;  %3473 = vmatpush3.bf16.msra.mxu1 %v3829_v59  ;;  %v3886_v59 = vld [vmem:[%s4917_s1 + $0x490] sm:$0xff]   ;;  %v3888_v62 = vld [vmem:[%s4917_s1 + $0x4c8] sm:$0xff]  }
  0x62   :  { %3502 = vmatprep.subr.bf16.mxu1 %v3831_v63 }
  0x63   :  { %2506 = vmatmul.mubr.bf16.vlgmr.msra.gmra.mxu0 %v621_v61  ;;  %v24_v61 = vld [vmem:[%s4916_s0 + $0x10] sm:$0xff] }
  0x64   :  { %3481 = vmatpush3.bf16.msra.mxu0 %v3832_v1  ;;  %2585 = vmatprep.mubr.bf16.mxu0 %v642_v0  ;;  %v654_v63 = vrot.slane %v24_v61, %v4162_v41  ;;  %v647_v0 = vcombine.high %v24_v61, %v24_v61  ;;  %v3889_v1 = vld [vmem:[%s4917_s1 + $0x408] sm:$0xff]  }
  0x65   :  { %2546 = vmatmul.mubr.bf16.vlgmr.msra.gmra.mxu1 %v643_v3  ;;  %3482 = vmatprep.subr.bf16.mxu0 %v3834_v4  ;;  %v3938_v61 = vld [vmem:[%s4917_s1 + $0x628] sm:$0xff]  }
  0x66   :  { %3503 = vmatpush3.bf16.msra.mxu1 %v3833_v2  ;;  %2625 = vmatprep.mubr.bf16.mxu1 %v646_v6  ;;  %v3890_v2 = vld [vmem:[%s4917_s1 + $0x488] sm:$0xff]   ;;  %v662_v3 = vcombine.high %v654_v63, %v654_v63  ;;  %v4560_v4 = vrot.slane %v647_v0, %v4162_v41  ;;  %v3892_v6 = vld [vmem:[%s4917_s1 + $0x4c0] sm:$0xff]  }
  0x67   :  { %3504 = vmatprep.subr.bf16.mxu1 %v3835_v5  ;;  %v3891_v5 = vld [vmem:[%s4917_s1 + $0x440] sm:$0xff]  }
  0x68   :  { %3483 = vmatpush3.bf16.msra.mxu0 %v3836_v7  ;;  %v684_v7 = vrot.slane %v662_v3, %v4162_v41  ;;  %v3941_v0 = vld [vmem:[%s4917_s1 + $0x6e0] sm:$0xff]   ;;  %v3944_v3 = vld [vmem:[%s4917_s1 + $0x658] sm:$0xff]  }
  0x69   :  { %3484 = vmatprep.subr.bf16.mxu0 %v3838_v9  ;;  %v3893_v9 = vld [vmem:[%s4917_s1 + $0x400] sm:$0xff]  }
  0x6a   :  { %3505 = vmatpush3.bf16.msra.mxu1 %v3837_v8  ;;  %v663_v8 = vcombine.high %v4560_v4, %v4560_v4 }
  0x6b   :  { %3506 = vmatprep.subr.bf16.mxu1 %v3839_v10  ;;  %v3894_v10 = vld [vmem:[%s4917_s1 + $0x480] sm:$0xff]  }
  0x6c   :  { %3485 = vmatpush3.bf16.msra.mxu0 %v3840_v11  ;;  %v694_v11 = vcombine.high %v684_v7, %v684_v7 }
  0x6d   :  { %3486 = vmatprep.subr.bf16.mxu0 %v3842_v13  ;;  %v3895_v13 = vld [vmem:[%s4917_s1 + $0x578] sm:$0xff]  }
  0x6e   :  { %3507 = vmatpush3.bf16.msra.mxu1 %v3841_v12  ;;  %v670_v12 = vrot.slane %v654_v63, %v4162_v41  ;;  %v3940_v63 = vld [vmem:[%s4917_s1 + $0x660] sm:$0xff]  }
  0x6f   :  { %3508 = vmatprep.subr.bf16.mxu1 %v3843_v14  ;;  %v3896_v14 = vld [vmem:[%s4917_s1 + $0x5f8] sm:$0xff]  }
  0x70   :  { %3487 = vmatpush3.bf16.msra.mxu0 %v3844_v15  ;;  %v691_v15 = vrot.slane %v663_v8, %v4162_v41  ;;  %v3949_v8 = vld [vmem:[%s4917_s1 + $0x6d0] sm:$0xff]  }
  0x71   :  { %3488 = vmatprep.subr.bf16.mxu0 %v3846_v17  ;;  %v3898_v17 = vld [vmem:[%s4917_s1 + $0x5b8] sm:$0xff]  }
  0x72   :  { %3509 = vmatpush3.bf16.msra.mxu1 %v3845_v16  ;;  %v3897_v16 = vld [vmem:[%s4917_s1 + $0x538] sm:$0xff]  }
  0x73   :  { %3510 = vmatprep.subr.bf16.mxu1 %v3847_v18  ;;  %v692_v18 = vcombine.high %v670_v12, %v670_v12 }
  0x74   :  { %3489 = vmatpush3.bf16.msra.mxu0 %v3848_v19  ;;  %v3899_v19 = vld [vmem:[%s4917_s1 + $0x570] sm:$0xff]  }
  0x75   :  { %3490 = vmatprep.subr.bf16.mxu0 %v3850_v21  ;;  %v695_v21 = vcombine.high %v691_v15, %v691_v15 }
  0x76   :  { %3511 = vmatpush3.bf16.msra.mxu1 %v3849_v20  ;;  %v3900_v20 = vld [vmem:[%s4917_s1 + $0x5f0] sm:$0xff]  }
  0x77   :  { %3512 = vmatprep.subr.bf16.mxu1 %v3851_v22  ;;  %v3901_v22 = vld [vmem:[%s4917_s1 + $0x530] sm:$0xff]  }
  0x78   :  { %3491 = vmatpush3.bf16.msra.mxu0 %v3852_v23  ;;  %v3902_v23 = vld [vmem:[%s4917_s1 + $0x5b0] sm:$0xff]  }
  0x79   :  { %3492 = vmatprep.subr.bf16.mxu0 %v3854_v25  ;;  %v3904_v25 = vld [vmem:[%s4917_s1 + $0x5e8] sm:$0xff]  }
  0x7a   :  { %3513 = vmatpush3.bf16.msra.mxu1 %v3853_v24  ;;  %v3903_v24 = vld [vmem:[%s4917_s1 + $0x568] sm:$0xff]  }
  0x7b   :  { %3514 = vmatprep.subr.bf16.mxu1 %v3855_v26  ;;  %v3905_v26 = vld [vmem:[%s4917_s1 + $0x528] sm:$0xff]  }
  0x7c   :  { %3493 = vmatpush3.bf16.msra.mxu0 %v3856_v27  ;;  %v3906_v27 = vld [vmem:[%s4917_s1 + $0x5a8] sm:$0xff]  }
  0x7d   :  { %3494 = vmatprep.subr.bf16.mxu0 %v3858_v29  ;;  %v3908_v29 = vld [vmem:[%s4917_s1 + $0x5e0] sm:$0xff]  }
  0x7e   :  { %3515 = vmatpush3.bf16.msra.mxu1 %v3857_v28  ;;  %v3907_v28 = vld [vmem:[%s4917_s1 + $0x560] sm:$0xff]  }
  0x7f   :  { %3516 = vmatprep.subr.bf16.mxu1 %v3859_v30  ;;  %v3909_v30 = vld [vmem:[%s4917_s1 + $0x520] sm:$0xff]  }
  0x80   :  { %3495 = vmatpush3.bf16.msra.mxu0 %v3860_v31  ;;  %v3910_v31 = vld [vmem:[%s4917_s1 + $0x5a0] sm:$0xff]  }
  0x81   :  { %3524 = vmatprep.subr.bf16.mxu0 %v3863_v34  ;;  %v3913_v34 = vld [vmem:[%s4917_s1 + $0x518] sm:$0xff]  }
  0x82   :  { %3517 = vmatpush3.bf16.msra.mxu1 %v3861_v32  ;;  %v3911_v32 = vld [vmem:[%s4917_s1 + $0x558] sm:$0xff]  }
  0x83   :  { %2586 = vmatmul.mubr.bf16.vlgmr.msra.gmra.mxu0 %v628_v33  ;;  %3546 = vmatprep.subr.bf16.mxu1 %v3864_v35  ;;  %v3912_v33 = vld [vmem:[%s4917_s1 + $0x5d8] sm:$0xff]  }
  0x84   :  { %3525 = vmatpush3.bf16.msra.mxu0 %v3865_v36  ;;  %2665 = vmatprep.mubr.bf16.mxu0 %v684_v7  ;;  %v3914_v35 = vld [vmem:[%s4917_s1 + $0x598] sm:$0xff]   ;;  %v3915_v36 = vld [vmem:[%s4917_s1 + $0x550] sm:$0xff]  }
  0x85   :  { %2626 = vmatmul.mubr.bf16.vlgmr.msra.gmra.mxu1 %v644_v38  ;;  %3526 = vmatprep.subr.bf16.mxu0 %v3867_v39  ;;  %v3917_v38 = vld [vmem:[%s4917_s1 + $0x510] sm:$0xff]  }
  0x86   :  { %3547 = vmatpush3.bf16.msra.mxu1 %v3866_v37  ;;  %2705 = vmatprep.mubr.bf16.mxu1 %v694_v11  ;;  %v3916_v37 = vld [vmem:[%s4917_s1 + $0x5d0] sm:$0xff]   ;;  %v3952_v11 = vld [vmem:[%s4917_s1 + $0x648] sm:$0xff]  }
  0x87   :  { %3548 = vmatprep.subr.bf16.mxu1 %v3868_v40  ;;  %v3918_v39 = vld [vmem:[%s4917_s1 + $0x590] sm:$0xff]   ;;  %v3919_v40 = vld [vmem:[%s4917_s1 + $0x548] sm:$0xff]  }
  0x88   :  { %3527 = vmatpush3.bf16.msra.mxu0 %v3869_v42  ;;  %v3920_v42 = vld [vmem:[%s4917_s1 + $0x5c8] sm:$0xff]   ;;  %v3948_v7 = vld [vmem:[%s4917_s1 + $0x650] sm:$0xff]  }
  0x89   :  { %3528 = vmatprep.subr.bf16.mxu0 %v3871_v44  ;;  %v3922_v44 = vld [vmem:[%s4917_s1 + $0x588] sm:$0xff]  }
  0x8a   :  { %3549 = vmatpush3.bf16.msra.mxu1 %v3870_v43  ;;  %v3921_v43 = vld [vmem:[%s4917_s1 + $0x508] sm:$0xff]  }
  0x8b   :  { %3550 = vmatprep.subr.bf16.mxu1 %v3872_v45  ;;  %v3923_v45 = vld [vmem:[%s4917_s1 + $0x540] sm:$0xff]  }
  0x8c   :  { %3529 = vmatpush3.bf16.msra.mxu0 %v3873_v46  ;;  %v3924_v46 = vld [vmem:[%s4917_s1 + $0x5c0] sm:$0xff]  }
  0x8d   :  { %3530 = vmatprep.subr.bf16.mxu0 %v3875_v48  ;;  %v3926_v48 = vld [vmem:[%s4917_s1 + $0x580] sm:$0xff]  }
  0x8e   :  { %3551 = vmatpush3.bf16.msra.mxu1 %v3874_v47  ;;  %v3925_v47 = vld [vmem:[%s4917_s1 + $0x500] sm:$0xff]  }
  0x8f   :  { %3552 = vmatprep.subr.bf16.mxu1 %v3876_v49  ;;  %v677_v49 = vrot.slane %v4560_v4, %v4162_v41  ;;  %v3945_v4 = vld [vmem:[%s4917_s1 + $0x6d8] sm:$0xff]  }
  0x90   :  { %3531 = vmatpush3.bf16.msra.mxu0 %v3877_v50  ;;  %v3928_v50 = vld [vmem:[%s4917_s1 + $0x678] sm:$0xff]  }
  0x91   :  { %3532 = vmatprep.subr.bf16.mxu0 %v3879_v52  ;;  %v3930_v52 = vld [vmem:[%s4917_s1 + $0x638] sm:$0xff]  }
  0x92   :  { %3553 = vmatpush3.bf16.msra.mxu1 %v3878_v51  ;;  %v3929_v51 = vld [vmem:[%s4917_s1 + $0x6f8] sm:$0xff]  }
  0x93   :  { %3554 = vmatprep.subr.bf16.mxu1 %v3880_v53  ;;  %v3931_v53 = vld [vmem:[%s4917_s1 + $0x6b8] sm:$0xff]  }
  0x94   :  { %3533 = vmatpush3.bf16.msra.mxu0 %v3881_v54  ;;  %v693_v54 = vcombine.high %v677_v49, %v677_v49 }
  0x95   :  { %3534 = vmatprep.subr.bf16.mxu0 %v3883_v56  ;;  %v3933_v56 = vld [vmem:[%s4917_s1 + $0x6f0] sm:$0xff]  }
  0x96   :  { %3555 = vmatpush3.bf16.msra.mxu1 %v3882_v55  ;;  %v3932_v55 = vld [vmem:[%s4917_s1 + $0x670] sm:$0xff]  }
  0x97   :  { %3556 = vmatprep.subr.bf16.mxu1 %v3884_v57  ;;  %v3934_v57 = vld [vmem:[%s4917_s1 + $0x630] sm:$0xff]  }
  0x98   :  { %3535 = vmatpush3.bf16.msra.mxu0 %v3885_v58  ;;  %v3935_v58 = vld [vmem:[%s4917_s1 + $0x6b0] sm:$0xff]  }
  0x99   :  { %3536 = vmatprep.subr.bf16.mxu0 %v3887_v60  ;;  %v3937_v60 = vld [vmem:[%s4917_s1 + $0x6e8] sm:$0xff]  }
  0x9a   :  { %3557 = vmatpush3.bf16.msra.mxu1 %v3886_v59  ;;  %v3936_v59 = vld [vmem:[%s4917_s1 + $0x668] sm:$0xff]  }
  0x9b   :  { %3558 = vmatprep.subr.bf16.mxu1 %v3888_v62  ;;  %v3939_v62 = vld [vmem:[%s4917_s1 + $0x6a8] sm:$0xff]  }
  0x9c   :  { %3537 = vmatpush3.bf16.msra.mxu0 %v3889_v1  ;;  %v3942_v1 = vld [vmem:[%s4917_s1 + $0x620] sm:$0xff]  }
  0x9d   :  { %3538 = vmatprep.subr.bf16.mxu0 %v3891_v5  ;;  %v3946_v5 = vld [vmem:[%s4917_s1 + $0x618] sm:$0xff]  }
  0x9e   :  { %3559 = vmatpush3.bf16.msra.mxu1 %v3890_v2  ;;  %v3943_v2 = vld [vmem:[%s4917_s1 + $0x6a0] sm:$0xff]  }
  0x9f   :  { %3560 = vmatprep.subr.bf16.mxu1 %v3892_v6  ;;  %v3947_v6 = vld [vmem:[%s4917_s1 + $0x698] sm:$0xff]  }
  0xa0   :  { %3539 = vmatpush3.bf16.msra.mxu0 %v3893_v9  ;;  %v3950_v9 = vld [vmem:[%s4917_s1 + $0x610] sm:$0xff]  }
  0xa1   :  { %3568 = vmatprep.subr.bf16.mxu0 %v3895_v13  ;;  %v3953_v13 = vld [vmem:[%s4917_s1 + $0x6c8] sm:$0xff]  }
  0xa2   :  { %3561 = vmatpush3.bf16.msra.mxu1 %v3894_v10  ;;  %v3951_v10 = vld [vmem:[%s4917_s1 + $0x690] sm:$0xff]  }
  0xa3   :  { %2666 = vmatmul.mubr.bf16.vlgmr.msra.gmra.mxu0 %v670_v12  ;;  %3590 = vmatprep.subr.bf16.mxu1 %v3896_v14  ;;  %v25_v12 = vld [vmem:[%s4916_s0 + $0x18] sm:$0xff] }
  0xa4   :  { %3569 = vmatpush3.bf16.msra.mxu0 %v3897_v16  ;;  %2745 = vmatprep.mubr.bf16.mxu0 %v691_v15  ;;  %v703_v14 = vrot.slane %v25_v12, %v4162_v41  ;;  %v696_v15 = vcombine.high %v25_v12, %v25_v12  ;;  %v3954_v16 = vld [vmem:[%s4917_s1 + $0x608] sm:$0xff]  }
  0xa5   :  { %2706 = vmatmul.mubr.bf16.vlgmr.msra.gmra.mxu1 %v692_v18  ;;  %3570 = vmatprep.subr.bf16.mxu0 %v3899_v19 }
  0xa6   :  { %3591 = vmatpush3.bf16.msra.mxu1 %v3898_v17  ;;  %2785 = vmatprep.mubr.bf16.mxu1 %v695_v21  ;;  %v3956_v17 = vld [vmem:[%s4917_s1 + $0x640] sm:$0xff]   ;;  %v711_v18 = vcombine.high %v703_v14, %v703_v14  ;;  %v4766_v19 = vrot.slane %v696_v15, %v4162_v41 }
  0xa7   :  { %3592 = vmatprep.subr.bf16.mxu1 %v3900_v20  ;;  %v3955_v20 = vld [vmem:[%s4917_s1 + $0x688] sm:$0xff]   ;;  %v3957_v21 = vld [vmem:[%s4917_s1 + $0x6c0] sm:$0xff]  }
  0xa8   :  { %3571 = vmatpush3.bf16.msra.mxu0 %v3901_v22  ;;  %v3958_v22 = vld [vmem:[%s4917_s1 + $0x600] sm:$0xff]  }
  0xa9   :  { %3572 = vmatprep.subr.bf16.mxu0 %v3903_v24  ;;  %v712_v24 = vcombine.high %v4766_v19, %v4766_v19 }
  0xaa   :  { %3593 = vmatpush3.bf16.msra.mxu1 %v3902_v23  ;;  %v733_v23 = vrot.slane %v711_v18, %v4162_v41 }
  0xab   :  { %3594 = vmatprep.subr.bf16.mxu1 %v3904_v25  ;;  %v3959_v25 = vld [vmem:[%s4917_s1 + $0x680] sm:$0xff]  }
  0xac   :  { %3573 = vmatpush3.bf16.msra.mxu0 %v3905_v26  ;;  %v743_v26 = vcombine.high %v733_v23, %v733_v23 }
  0xad   :  { %3574 = vmatprep.subr.bf16.mxu0 %v3907_v28  ;;  %v3960_v28 = vld [vmem:[%s4917_s1 + $0x778] sm:$0xff]  }
  0xae   :  { %3595 = vmatpush3.bf16.msra.mxu1 %v3906_v27  ;;  %v719_v27 = vrot.slane %v703_v14, %v4162_v41 }
  0xaf   :  { %3596 = vmatprep.subr.bf16.mxu1 %v3908_v29  ;;  %v3961_v29 = vld [vmem:[%s4917_s1 + $0x7f8] sm:$0xff]  }
  0xb0   :  { %3575 = vmatpush3.bf16.msra.mxu0 %v3909_v30  ;;  %v740_v30 = vrot.slane %v712_v24, %v4162_v41 }
  0xb1   :  { %3576 = vmatprep.subr.bf16.mxu0 %v3911_v32  ;;  %v3963_v32 = vld [vmem:[%s4917_s1 + $0x7b8] sm:$0xff]  }
  0xb2   :  { %3597 = vmatpush3.bf16.msra.mxu1 %v3910_v31  ;;  %v3962_v31 = vld [vmem:[%s4917_s1 + $0x738] sm:$0xff]  }
  0xb3   :  { %3598 = vmatprep.subr.bf16.mxu1 %v3912_v33  ;;  %v741_v33 = vcombine.high %v719_v27, %v719_v27 }
  0xb4   :  { %3577 = vmatpush3.bf16.msra.mxu0 %v3913_v34  ;;  %v3964_v34 = vld [vmem:[%s4917_s1 + $0x770] sm:$0xff]  }
  0xb5   :  { %3578 = vmatprep.subr.bf16.mxu0 %v3915_v36  ;;  %v744_v36 = vcombine.high %v740_v30, %v740_v30 }
  0xb6   :  { %3599 = vmatpush3.bf16.msra.mxu1 %v3914_v35  ;;  %v3965_v35 = vld [vmem:[%s4917_s1 + $0x7f0] sm:$0xff]  }
  0xb7   :  { %3600 = vmatprep.subr.bf16.mxu1 %v3916_v37 }
  0xb8   :  { %3579 = vmatpush3.bf16.msra.mxu0 %v3917_v38  ;;  %v3082_v38 = vld [vmem:[%s4918_s2] ss:$0 sm:$0xff] }
  0xb9   :  { %3580 = vmatprep.subr.bf16.mxu0 %v3919_v40  ;;  %v3967_v40 = vld [vmem:[%s4917_s1 + $0x7b0] sm:$0xff]  }
  0xba   :  { %3601 = vmatpush3.bf16.msra.mxu1 %v3918_v39  ;;  %v3966_v39 = vld [vmem:[%s4917_s1 + $0x730] sm:$0xff]  }
  0xbb   :  { %3602 = vmatprep.subr.bf16.mxu1 %v3920_v42 }
  0xbc   :  { %3581 = vmatpush3.bf16.msra.mxu0 %v3921_v43 }
  0xbd   :  { %3582 = vmatprep.subr.bf16.mxu0 %v3923_v45 }
  0xbe   :  { %3603 = vmatpush3.bf16.msra.mxu1 %v3922_v44  ;;  %v3968_v44 = vld [vmem:[%s4917_s1 + $0x768] sm:$0xff]  }
  0xbf   :  { %3604 = vmatprep.subr.bf16.mxu1 %v3924_v46  ;;  %v3969_v46 = vld [vmem:[%s4917_s1 + $0x7e8] sm:$0xff]  }
  0xc0   :  { %3583 = vmatpush3.bf16.msra.mxu0 %v3925_v47 }
  0xc1   :  { %3612 = vmatprep.subr.bf16.mxu0 %v3928_v50 }
  0xc2   :  { %3605 = vmatpush3.bf16.msra.mxu1 %v3926_v48 }
  0xc3   :  { %2746 = vmatmul.mubr.bf16.vlgmr.msra.gmra.mxu0 %v677_v49  ;;  %3634 = vmatprep.subr.bf16.mxu1 %v3929_v51  ;;  %v3970_v49 = vld [vmem:[%s4917_s1 + $0x728] sm:$0xff]  }
  0xc4   :  { %3613 = vmatpush3.bf16.msra.mxu0 %v3930_v52  ;;  %2825 = vmatprep.mubr.bf16.mxu0 %v733_v23  ;;  %v3971_v52 = vld [vmem:[%s4917_s1 + $0x7a8] sm:$0xff]  }
  0xc5   :  { %2786 = vmatmul.mubr.bf16.vlgmr.msra.gmra.mxu1 %v693_v54  ;;  %3614 = vmatprep.subr.bf16.mxu0 %v3932_v55  ;;  %v3972_v55 = vld [vmem:[%s4917_s1 + $0x760] sm:$0xff]  }
  0xc6   :  { %3635 = vmatpush3.bf16.msra.mxu1 %v3931_v53  ;;  %2865 = vmatprep.mubr.bf16.mxu1 %v743_v26 }
  0xc7   :  { %3636 = vmatprep.subr.bf16.mxu1 %v3933_v56 }
  0xc8   :  { %3615 = vmatpush3.bf16.msra.mxu0 %v3934_v57  ;;  %v3973_v57 = vld [vmem:[%s4917_s1 + $0x7e0] sm:$0xff]  }
  0xc9   :  { %3616 = vmatprep.subr.bf16.mxu0 %v3936_v59  ;;  %v3974_v59 = vld [vmem:[%s4917_s1 + $0x720] sm:$0xff]  }
  0xca   :  { %3637 = vmatpush3.bf16.msra.mxu1 %v3935_v58 }
  0xcb   :  { %3638 = vmatprep.subr.bf16.mxu1 %v3937_v60  ;;  %v3975_v60 = vld [vmem:[%s4917_s1 + $0x7a0] sm:$0xff]  }
  0xcc   :  { %3617 = vmatpush3.bf16.msra.mxu0 %v3938_v61  ;;  %v3976_v61 = vld [vmem:[%s4917_s1 + $0x758] sm:$0xff]  }
  0xcd   :  { %3618 = vmatprep.subr.bf16.mxu0 %v3940_v63  ;;  %v3978_v63 = vld [vmem:[%s4917_s1 + $0x718] sm:$0xff]  }
  0xce   :  { %3639 = vmatpush3.bf16.msra.mxu1 %v3939_v62  ;;  %v3977_v62 = vld [vmem:[%s4917_s1 + $0x7d8] sm:$0xff]  }
  0xcf   :  { %3640 = vmatprep.subr.bf16.mxu1 %v3941_v0  ;;  %v3979_v0 = vld [vmem:[%s4917_s1 + $0x798] sm:$0xff]  }
  0xd0   :  { %3619 = vmatpush3.bf16.msra.mxu0 %v3942_v1  ;;  %v3980_v1 = vld [vmem:[%s4917_s1 + $0x750] sm:$0xff]  }
  0xd1   :  { %3620 = vmatprep.subr.bf16.mxu0 %v3944_v3  ;;  %v3982_v3 = vld [vmem:[%s4917_s1 + $0x710] sm:$0xff]  }
  0xd2   :  { %3641 = vmatpush3.bf16.msra.mxu1 %v3943_v2  ;;  %v3981_v2 = vld [vmem:[%s4917_s1 + $0x7d0] sm:$0xff]  }
  0xd3   :  { %3642 = vmatprep.subr.bf16.mxu1 %v3945_v4  ;;  %v3983_v4 = vld [vmem:[%s4917_s1 + $0x790] sm:$0xff]  }
  0xd4   :  { %3621 = vmatpush3.bf16.msra.mxu0 %v3946_v5  ;;  %v3984_v5 = vld [vmem:[%s4917_s1 + $0x748] sm:$0xff]  }
  0xd5   :  { %3622 = vmatprep.subr.bf16.mxu0 %v3948_v7  ;;  %v3986_v7 = vld [vmem:[%s4917_s1 + $0x708] sm:$0xff]  }
  0xd6   :  { %3643 = vmatpush3.bf16.msra.mxu1 %v3947_v6  ;;  %v3985_v6 = vld [vmem:[%s4917_s1 + $0x7c8] sm:$0xff]  }
  0xd7   :  { %3644 = vmatprep.subr.bf16.mxu1 %v3949_v8  ;;  %v3988_v8 = vld [vmem:[%s4917_s1 + $0x740] sm:$0xff]  }
  0xd8   :  { %3623 = vmatpush3.bf16.msra.mxu0 %v3950_v9  ;;  %v3987_v9 = vld [vmem:[%s4917_s1 + $0x788] sm:$0xff]  }
  0xd9   :  { %3624 = vmatprep.subr.bf16.mxu0 %v3952_v11  ;;  %v3990_v11 = vld [vmem:[%s4917_s1 + $0x700] sm:$0xff]  }
  0xda   :  { %3645 = vmatpush3.bf16.msra.mxu1 %v3951_v10  ;;  %v3989_v10 = vld [vmem:[%s4917_s1 + $0x7c0] sm:$0xff]  }
  0xdb   :  { %3646 = vmatprep.subr.bf16.mxu1 %v3953_v13 }
  0xdc   :  { %3625 = vmatpush3.bf16.msra.mxu0 %v3954_v16 }
  0xdd   :  { %3626 = vmatprep.subr.bf16.mxu0 %v3956_v17 }
  0xde   :  { %3647 = vmatpush3.bf16.msra.mxu1 %v3955_v20 }
  0xdf   :  { %3648 = vmatprep.subr.bf16.mxu1 %v3957_v21 }
  0xe0   :  { %3627 = vmatpush3.bf16.msra.mxu0 %v3958_v22 }
  0xe1   :  { %3656 = vmatprep.subr.bf16.mxu0 %v3960_v28 }
  0xe2   :  { %3649 = vmatpush3.bf16.msra.mxu1 %v3959_v25 }
  0xe3   :  { %v3364_v37 = vpop.f32.mrf.mxu0  ;;  %2826 = vmatmul.mubr.bf16.vlgmr.msra.gmra.mxu0 %v719_v27  ;;  %3678 = vmatprep.subr.bf16.mxu1 %v3961_v29 }
  0xe4   :  { %3657 = vmatpush3.bf16.msra.mxu0 %v3962_v31  ;;  %2905 = vmatprep.mubr.bf16.mxu0 %v740_v30  ;;  %v3386_v42 = vpop.f32.mrf.mxu1 }
  0xe5   :  { %2866 = vmatmul.mubr.bf16.vlgmr.msra.gmra.mxu1 %v741_v33  ;;  %v3365_v43 = vpop.f32.mrf.mxu0  ;;  %3658 = vmatprep.subr.bf16.mxu0 %v3964_v34 }
  0xe6   :  { %3679 = vmatpush3.bf16.msra.mxu1 %v3963_v32  ;;  %v3366_v45 = vadd.f32 %v3365_v43, %v3364_v37  ;;  %2945 = vmatprep.mubr.bf16.mxu1 %v744_v36  ;;  %v3387_v47 = vpop.f32.mrf.mxu1 }
  0xe7   :  { %v3367_v48 = vpop.f32.mrf.mxu0  ;;  %3680 = vmatprep.subr.bf16.mxu1 %v3965_v35  ;;  %v3388_v51 = vadd.f32 %v3387_v47, %v3386_v42 }
  0xe8   :  { %v2348_v50 = vadd.f32 %v3366_v45, %v3082_v38  ;;  %3659 = vmatpush3.bf16.msra.mxu0 %v3966_v39  ;;  %v3389_v53 = vpop.f32.mrf.mxu1 }
  0xe9   :  { %v3368_v54 = vpop.f32.mrf.mxu0  ;;  %3660 = vmatprep.subr.bf16.mxu0 %v3968_v44 }
  0xea   :  { %v2388_v56 = vadd.f32 %v3388_v51, %v2348_v50  ;;  %3681 = vmatpush3.bf16.msra.mxu1 %v3967_v40  ;;  %v3390_v58 = vpop.f32.mrf.mxu1 }
  0xeb   :  { %3682 = vmatprep.subr.bf16.mxu1 %v3969_v46 }
  0xec   :  { %3661 = vmatpush3.bf16.msra.mxu0 %v3970_v49 }
  0xed   :  { %3662 = vmatprep.subr.bf16.mxu0 %v3972_v55 }
  0xee   :  { %3683 = vmatpush3.bf16.msra.mxu1 %v3971_v52 }
  0xef   :  { %3684 = vmatprep.subr.bf16.mxu1 %v3973_v57 }
  0xf0   :  { %3663 = vmatpush3.bf16.msra.mxu0 %v3974_v59 }
  0xf1   :  { %3664 = vmatprep.subr.bf16.mxu0 %v3976_v61 }
  0xf2   :  { %3685 = vmatpush3.bf16.msra.mxu1 %v3975_v60 }
  0xf3   :  { %3686 = vmatprep.subr.bf16.mxu1 %v3977_v62 }
  0xf4   :  { %3665 = vmatpush3.bf16.msra.mxu0 %v3978_v63 }
  0xf5   :  { %3666 = vmatprep.subr.bf16.mxu0 %v3980_v1 }
  0xf6   :  { %3687 = vmatpush3.bf16.msra.mxu1 %v3979_v0 }
  0xf7   :  { %3688 = vmatprep.subr.bf16.mxu1 %v3981_v2 }
  0xf8   :  { %3667 = vmatpush3.bf16.msra.mxu0 %v3982_v3 }
  0xf9   :  { %3668 = vmatprep.subr.bf16.mxu0 %v3984_v5 }
  0xfa   :  { %3689 = vmatpush3.bf16.msra.mxu1 %v3983_v4 }
  0xfb   :  { %3690 = vmatprep.subr.bf16.mxu1 %v3985_v6 }
  0xfc   :  { %3669 = vmatpush3.bf16.msra.mxu0 %v3986_v7 }
  0xfd   :  { %10 = vsyncpa [#allocation3], 0  ;;  %3670 = vmatprep.subr.bf16.mxu0 %v3988_v8  ;;  %v726_v12 = vrot.slane %v4766_v19, %v4162_v41  ;;  %v3991_v13 = vld [vmem:[%s4917_s1 + $0x780] sm:$0xff]   ;;  %v3993_v38 = vld [vmem:[%s4919_s3 + $0x38] sm:$0xff]   ;;  %v4024_v39 = vmov 0.0   ;;  %vm4025_vm0 = vmmov 0  }
  0xfe   :  { %3691 = vmatpush3.bf16.msra.mxu1 %v3987_v9  ;;  %v3994_v40 = vld [vmem:[%s4919_s3 + $0x30] sm:$0xff]   ;;  %v3995_v42 = vld [vmem:[%s4919_s3 + $0x28] sm:$0xff]   ;;  %v3996_v43 = vld [vmem:[%s4919_s3 + $0x20] sm:$0xff]   ;;  %s4026_s24 = smov [#allocation2]   ;;  %vm3066_vm1 = vcmask 107520  }
  0xff   :  { %3692 = vmatprep.subr.bf16.mxu1 %v3989_v10  ;;  %v742_v14 = vcombine.high %v726_v12, %v726_v12  ;;  %v3997_v44 = vld [vmem:[%s4919_s3 + $0x18] sm:$0xff]   ;;  %v3998_v48 = vld [vmem:[%s4919_s3 + $0x10] sm:$0xff]   ;;  %v4000_v59 = vld [vmem:[%s4919_s3] sm:$0xff]   ;;  %s3074_s25 = sshll.u32 %s4026_s24, 4  ;;  %s3075_s25 = int_to_ptr.vmem [resolvable:$true] %s3074_s25 }
 0x100   :  { %3671 = vmatpush3.bf16.msra.mxu0 %v3990_v11  ;;  %s4001_s26 = scalar_lea.vmem %s3075_s25, 32  ;;  %p4006_p1 = scmp.lt.s32.totalorder %s3075_s25, %s3075_s25 }
 0x101   :  { %3709 = vmatprep.subr.bf16.mxu0 %v4024_v39  ;;  %p4002_p0 = scmp.ne.s32.totalorder %s3075_s25, %s4001_s26  ;;  %p4007_p2 = scmp.lt.s32.totalorder %s4001_s26, %s4001_s26 }
 0x102   :  { %3693 = vmatpush3.bf16.msra.mxu1 %v3991_v13 }
 0x103   :  { %v3408_v15 = vpop.f32.mrf.mxu0  ;;  %2906 = vmatmul.mubr.bf16.vlgmr.msra.gmra.mxu0 %v726_v12  ;;  %p4008_p3 = por %p4007_p2, %p4006_p1 }
 0x104   :  { %v3430_v16 = vpop.f32.mrf.mxu1  ;;  %3710 = vmatpush3.bf16.msra.mxu0 %v3993_v38  ;;  %3725 = vmatprep.mubr.msk.bf16.mxu0 %vm4025_vm0, %v4024_v39 }
 0x105   :  { %2946 = vmatmul.mubr.bf16.vlgmr.msra.gmra.mxu1 %v742_v14  ;;  %v3409_v17 = vpop.f32.mrf.mxu0  ;;  %3711 = vmatprep.subr.bf16.mxu0 %v4024_v39  ;;  %p4009_p4 = pnand %p4008_p3, %p4002_p0 }
 0x106   :  { %v3410_v18 = vadd.f32 %v3409_v17, %v3408_v15  ;;  %v3431_v20 = vpop.f32.mrf.mxu1 }
 0x107   :  { %v3411_v21 = vpop.f32.mrf.mxu0  ;;  %v3432_v23 = vadd.f32 %v3431_v20, %v3430_v16 }
 0x108   :  { %v2428_v22 = vadd.f32 %v3410_v18, %v2388_v56  ;;  %v3433_v41 = vpop.f32.mrf.mxu1  ;;  %3712 = vmatpush3.bf16.msra.mxu0 %v3994_v40  ;;  %v3999_v56 = vld [vmem:[%s4919_s3 + $0x8] sm:$0xff]  }
 0x109   :  { %v3412_v19 = vpop.f32.mrf.mxu0  ;;  %3713 = vmatprep.subr.bf16.mxu0 %v4024_v39 }
 0x10a   :  { %v2468_v24 = vadd.f32 %v3432_v23, %v2428_v22  ;;  %v3434_v25 = vpop.f32.mrf.mxu1 }
 0x10c   :  { %3714 = vmatpush3.bf16.msra.mxu0 %v3995_v42 }
 0x10d   :  { %3715 = vmatprep.subr.bf16.mxu0 %v4024_v39 }
 0x110   :  { %3716 = vmatpush3.bf16.msra.mxu0 %v3996_v43 }
 0x111   :  { %3717 = vmatprep.subr.bf16.mxu0 %v4024_v39 }
 0x114   :  { %3718 = vmatpush3.bf16.msra.mxu0 %v3997_v44 }
 0x115   :  { %3719 = vmatprep.subr.bf16.mxu0 %v4024_v39 }
 0x118   :  { %3720 = vmatpush3.bf16.msra.mxu0 %v3998_v48 }
 0x119   :  { %3721 = vmatprep.subr.bf16.mxu0 %v4024_v39 }
 0x11c   :  { %3722 = vmatpush3.bf16.msra.mxu0 %v3999_v56 }
 0x11d   :  { %3723 = vmatprep.subr.bf16.mxu0 %v4024_v39 }
 0x120   :  { %3724 = vmatpush3.bf16.msra.mxu0 %v4000_v59 }
 0x123   :  { %v3452_v26 = vpop.f32.mrf.mxu0 }
 0x125   :  { %v3474_v27 = vpop.f32.mrf.mxu1  ;;  %v3453_v28 = vpop.f32.mrf.mxu0 }
 0x126   :  { %v3454_v29 = vadd.f32 %v3453_v28, %v3452_v26 }
 0x127   :  { %v3475_v30 = vpop.f32.mrf.mxu1  ;;  %v3455_v31 = vpop.f32.mrf.mxu0 }
 0x128   :  { %v2508_v32 = vadd.f32 %v3454_v29, %v2468_v24  ;;  %v3476_v33 = vadd.f32 %v3475_v30, %v3474_v27 }
 0x129   :  { %v3477_v34 = vpop.f32.mrf.mxu1  ;;  %v3456_v35 = vpop.f32.mrf.mxu0 }
 0x12a   :  { %v2548_v36 = vadd.f32 %v3476_v33, %v2508_v32 }
 0x12b   :  { %v3478_v37 = vpop.f32.mrf.mxu1 }
 0x143   :  { %v3496_v45 = vpop.f32.mrf.mxu0 }
 0x145   :  { %v3518_v46 = vpop.f32.mrf.mxu1  ;;  %v3497_v47 = vpop.f32.mrf.mxu0 }
 0x146   :  { %v3498_v49 = vadd.f32 %v3497_v47, %v3496_v45 }
 0x147   :  { %v3519_v50 = vpop.f32.mrf.mxu1  ;;  %v3499_v51 = vpop.f32.mrf.mxu0 }
 0x148   :  { %v2588_v52 = vadd.f32 %v3498_v49, %v2548_v36  ;;  %v3520_v53 = vadd.f32 %v3519_v50, %v3518_v46  ;;  %v3339_v46 = vld [vmem:[%s4920_s4] ss:$0 sm:$0xff] }
 0x149   :  { %v3521_v54 = vpop.f32.mrf.mxu1  ;;  %v3500_v55 = vpop.f32.mrf.mxu0 }
 0x14a   :  { %v2628_v57 = vadd.f32 %v3520_v53, %v2588_v52 }
 0x14b   :  { %v3522_v58 = vpop.f32.mrf.mxu1 }
 0x163   :  { %v3540_v60 = vpop.f32.mrf.mxu0 }
 0x165   :  { %v3562_v61 = vpop.f32.mrf.mxu1  ;;  %v3541_v62 = vpop.f32.mrf.mxu0 }
 0x166   :  { %v3542_v63 = vadd.f32 %v3541_v62, %v3540_v60 }
 0x167   :  { %v3563_v0 = vpop.f32.mrf.mxu1  ;;  %v3543_v1 = vpop.f32.mrf.mxu0 }
 0x168   :  { %v2668_v2 = vadd.f32 %v3542_v63, %v2628_v57  ;;  %v3564_v3 = vadd.f32 %v3563_v0, %v3562_v61 }
 0x169   :  { %v3565_v4 = vpop.f32.mrf.mxu1  ;;  %v3544_v5 = vpop.f32.mrf.mxu0 }
 0x16a   :  { %v2708_v6 = vadd.f32 %v3564_v3, %v2668_v2 }
 0x16b   :  { %v3566_v7 = vpop.f32.mrf.mxu1 }
 0x183   :  { %v3584_v8 = vpop.f32.mrf.mxu0 }
 0x185   :  { %v3606_v9 = vpop.f32.mrf.mxu1  ;;  %v3585_v10 = vpop.f32.mrf.mxu0 }
 0x186   :  { %v3586_v19 = vadd.f32 %v3585_v10, %v3584_v8 }
 0x187   :  { %v3607_v11 = vpop.f32.mrf.mxu1  ;;  %v3587_v12 = vpop.f32.mrf.mxu0 }
 0x188   :  { %v2748_v24 = vadd.f32 %v3586_v19, %v2708_v6  ;;  %v3608_v25 = vadd.f32 %v3607_v11, %v3606_v9 }
 0x189   :  { %v3609_v13 = vpop.f32.mrf.mxu1  ;;  %v3588_v14 = vpop.f32.mrf.mxu0 }
 0x18a   :  { %v2788_v27 = vadd.f32 %v3608_v25, %v2748_v24 }
 0x18b   :  { %v3610_v15 = vpop.f32.mrf.mxu1 }
 0x1a3   :  { %v3628_v16 = vpop.f32.mrf.mxu0 }
 0x1a5   :  { %v3650_v17 = vpop.f32.mrf.mxu1  ;;  %v3629_v18 = vpop.f32.mrf.mxu0 }
 0x1a6   :  { %v3630_v26 = vadd.f32 %v3629_v18, %v3628_v16 }
 0x1a7   :  { %v3651_v20 = vpop.f32.mrf.mxu1  ;;  %v3631_v21 = vpop.f32.mrf.mxu0 }
 0x1a8   :  { %v2828_v28 = vadd.f32 %v3630_v26, %v2788_v27  ;;  %v3652_v29 = vadd.f32 %v3651_v20, %v3650_v17 }
 0x1a9   :  { %v3653_v22 = vpop.f32.mrf.mxu1  ;;  %v3632_v23 = vpop.f32.mrf.mxu0 }
 0x1aa   :  { %v2868_v33 = vadd.f32 %v3652_v29, %v2828_v28 }
 0x1ab   :  { %v3654_v41 = vpop.f32.mrf.mxu1 }
 0x1c3   :  { %v3672_v30 = vpop.f32.mrf.mxu0 }
 0x1c5   :  { %v3694_v31 = vpop.f32.mrf.mxu1  ;;  %v3673_v32 = vpop.f32.mrf.mxu0 }
 0x1c6   :  { %v3674_v34 = vadd.f32 %v3673_v32, %v3672_v30 }
 0x1c7   :  { %v3695_v35 = vpop.f32.mrf.mxu1  ;;  %v3675_v36 = vpop.f32.mrf.mxu0 }
 0x1c8   :  { %v2908_v37 = vadd.f32 %v3674_v34, %v2868_v33  ;;  %v3696_v38 = vadd.f32 %v3695_v35, %v3694_v31 }
 0x1c9   :  { %v3697_v39 = vpop.f32.mrf.mxu1  ;;  %v3676_v40 = vpop.f32.mrf.mxu0 }
 0x1ca   :  { %v2948_v42 = vadd.f32 %v3696_v38, %v2908_v37 }
 0x1cb   :  { %v3698_v43 = vpop.f32.mrf.mxu1 }
 0x1cc   :  { %v2953_v44 = vmax.f32 %v2948_v42, 0.0 }
 0x1ce   :  { %v2954_v45 = vpack.c.bf16 %v2953_v44, %v2953_v44 }
 0x1d0   :  { %3726 = vmatmul.mubr.bf16.vlgmr.msra.gmra.mxu0 %v2954_v45 }
 0x290   :  { %v3060_v47 = vpop.f32.mrf.mxu0 }
 0x291   :  { %v3061_v48 = vadd.f32 %v3339_v46, %v3060_v47 }
 0x292   :  { %v3727_v49 = vpop.f32.mrf.mxu0 }
 0x293   :  { %3067 = vst.msk [vmem:[#allocation2] sm:$0x3] %vm3066_vm1, %v3061_v48 }
 0x294   :  { %v3063_v50 = vpop.f32.mrf.mxu0 }
 0x295   :  { %4012 = shalt.err (!%p4009_p4)
}
 0x296   :  { %3077 = dma.vmem_to_hbm [thread:$0]  %s3075_s25, 32, %s4921_s5, [#allocation3]   ;;  %v3728_v51 = vpop.f32.mrf.mxu0 }
 0x297   :  { %4021 = dma.done.wait [#allocation3], 32  }
 0x298   :  { %4022 = vsyncadd [#allocation3], 4294967264 }
 0x299   :  { %3081 = vsyncpa [#allocation3], 1 }

</bundles_post_ra>
